<compile_context>
chip_gen: v5e
topology: v5e:2x2
jax: 0.10.0
libtpu: 0.0.40
codegen_flags: <defaults>
</compile_context>

<pallas_src>
import functools

import jax
import jax.numpy as jnp
from jax import lax
from jax.experimental import pallas as pl
from jax.experimental.pallas import tpu as pltpu

KSIZE = 7
PAD = 3          # 'same' padding for kernel_size=7
_C_CHUNK = 8     # sublane chunk for the fused channel reduction
_LANE = 128


def _round_up(v, m):
    return (v + m - 1) // m * m


def _spatial_attention_kernel(x_ref, jcol_ref, irow_ref, w_ref, o_ref,
                              colpad_ref, rowpad_ref, *, C, H, W, cpad, rpad):
    # x_ref   : (Nb, C, HW)  VMEM block (Nb batch elements, lane-dense)
    # jcol_ref: (1, HW) int32, flat column index (p % W)
    # irow_ref: (1, HW) int32, flat row index    (p // W)
    # w_ref   : (2*7*7,) f32 SMEM, flattened conv weight in (in_ch, kh, kw) order
    # o_ref   : (Nb, 1, HW) VMEM output block
    # colpad_ref: (2, Nb, cpad+HW+cpad) VMEM scratch for horizontal shifts
    # rowpad_ref: (Nb, rpad+HW+rpad)    VMEM scratch for vertical shifts
    Nb = x_ref.shape[0]
    HW = H * W
    f32 = jnp.float32

    # ---- fused single-pass channel mean + max (lane-dense (Nb, C, HW)) ----
    c_hi = min(C, _C_CHUNK)
    chunk = x_ref[:, 0:c_hi, :].astype(f32)           # (Nb, c_hi, HW)
    run_sum = jnp.sum(chunk, axis=1)                  # (Nb, HW)
    run_max = jnp.max(chunk, axis=1)
    for c0 in range(_C_CHUNK, C, _C_CHUNK):
        c1 = min(C, c0 + _C_CHUNK)
        chunk = x_ref[:, c0:c1, :].astype(f32)
        run_sum = run_sum + jnp.sum(chunk, axis=1)
        run_max = jnp.maximum(run_max, jnp.max(chunk, axis=1))
    avg = run_sum * (1.0 / C)
    mx = run_max

    # ---- hoist all 2*7*7 conv weights out of the MAC loops (SMEM reads) ----
    w = [w_ref[t] for t in range(2 * KSIZE * KSIZE)]

    # ---- boundary masks from the precomputed flat col/row index vectors ----
    j = jcol_ref[...]                                 # (1, HW) int32
    i = irow_ref[...]                                 # (1, HW) int32
    col_ok = [None] * KSIZE
    row_ok = [None] * KSIZE
    for k in range(KSIZE):
        d = k - PAD
        if d != 0:
            col_ok[k] = jnp.logical_and(j + d >= 0, j + d < W)
            row_ok[k] = jnp.logical_and(i + d >= 0, i + d < H)

    # ---- stage 1: 7 horizontal (lane) shifts per plane, masked (14 total) ----
    colsh = [[None] * KSIZE, [None] * KSIZE]
    for c, plane in enumerate((avg, mx)):
        colpad_ref[c, :, cpad:cpad + HW] = plane      # aligned interior store
        for kw in range(KSIZE):
            d = kw - PAD
            if d == 0:
                colsh[c][kw] = plane
            else:
                sl = colpad_ref[c, :, cpad + d:cpad + d + HW]   # (Nb, HW)
                colsh[c][kw] = jnp.where(col_ok[kw], sl, 0.0)

    # ---- stage 2: per-kh weighted combine (4 accumulator chains) + one
    #      vertical shift per kh; accumulate the 7 row contributions. ----
    zero = jnp.zeros((Nb, HW), f32)
    out_acc = [zero, zero]
    for kh in range(KSIZE):
        part = [zero, zero, zero, zero]
        t = 0
        for c in range(2):
            base = c * KSIZE * KSIZE + kh * KSIZE
            for kw in range(KSIZE):
                part[t % 4] = part[t % 4] + w[base + kw] * colsh[c][kw]
                t += 1
        s_kh = (part[0] + part[1]) + (part[2] + part[3])
        d = kh - PAD
        if d == 0:
            contrib = s_kh
        else:
            rowpad_ref[:, rpad:rpad + HW] = s_kh      # aligned interior store
            sl = rowpad_ref[:, rpad + d * W:rpad + d * W + HW]  # (Nb, HW)
            contrib = jnp.where(row_ok[kh], sl, 0.0)
        out_acc[kh % 2] = out_acc[kh % 2] + contrib

    y = out_acc[0] + out_acc[1]
    o_ref[:, 0, :] = jax.nn.sigmoid(y).astype(o_ref.dtype)


def spatial_attention(x, conv_weight, *, batch_block=None):
    """x: (N, C, H, W); conv_weight: (1, 2, 7, 7), no bias. Returns (N,1,H,W)."""
    N, C, H, W = x.shape
    HW = H * W

    if batch_block is None:
        # Batch several images per grid step (sublane density, amortized per-step
        # overhead) but keep >= 2 grid steps so both v7x TensorCores get work.
        batch_block = max(1, min(8, N // 2))
    while N % batch_block:
        batch_block -= 1
    Nb = batch_block

    # TODO(synk): for very large C*H*W (v7x only has 64 MiB VMEM) add an extra
    # "arbitrary" C-tiling grid axis with running sum/max accumulators.

    x_flat = x.reshape(N, C, HW)                           # lane-dense layout
    w_flat = conv_weight.reshape(-1).astype(jnp.float32)   # (98,) SMEM scalars
    p = jnp.arange(HW, dtype=jnp.int32)
    jcol = (p % W).reshape(1, HW)
    irow = (p // W).reshape(1, HW)

    cpad = _LANE                                           # aligned interior
    rpad = _round_up(PAD * W, _LANE)

    kernel = functools.partial(_spatial_attention_kernel,
                               C=C, H=H, W=W, cpad=cpad, rpad=rpad)

    out_flat = pl.pallas_call(
        kernel,
        out_shape=jax.ShapeDtypeStruct((N, 1, HW), x.dtype),
        grid_spec=pltpu.PrefetchScalarGridSpec(
            num_scalar_prefetch=0,
            grid=(N // Nb,),
            in_specs=[
                pl.BlockSpec((Nb, C, HW), lambda n: (n, 0, 0)),
                pl.BlockSpec((1, HW), lambda n: (0, 0)),
                pl.BlockSpec((1, HW), lambda n: (0, 0)),
                pl.BlockSpec(memory_space=pltpu.MemorySpace.SMEM),
            ],
            out_specs=pl.BlockSpec((Nb, 1, HW), lambda n: (n, 0, 0)),
            scratch_shapes=[
                pltpu.VMEM((2, Nb, cpad + HW + cpad), jnp.float32),
                pltpu.VMEM((Nb, rpad + HW + rpad), jnp.float32),
            ],
        ),
        compiler_params=pltpu.CompilerParams(
            dimension_semantics=("parallel",),
            vmem_limit_bytes=64 * 1024 * 1024,
        ),
    )(x_flat, jcol, irow, w_flat)

    return out_flat.reshape(N, 1, H, W)


def _reference(x, conv_weight):
    avg = jnp.mean(x, axis=1, keepdims=True)
    mx = jnp.max(x, axis=1, keepdims=True)
    cat = jnp.concatenate([avg, mx], axis=1)
    y = lax.conv_general_dilated(
        cat, conv_weight, window_strides=(1, 1),
        padding=[(PAD, PAD), (PAD, PAD)],
        dimension_numbers=("NCHW", "OIHW", "NCHW"))
    return jax.nn.sigmoid(y)


if __name__ == "__main__":
    key = jax.random.PRNGKey(0)
    kx, kw = jax.random.split(key)

    N, C, H, W = 2, 4, 16, 16
    x = jax.random.normal(kx, (N, C, H, W), dtype=jnp.float32)
    # Deterministic synthetic conv weight: (out=1, in=2, 7, 7), no bias.
    conv_weight = 0.1 * jax.random.normal(kw, (1, 2, KSIZE, KSIZE),
                                          dtype=jnp.float32)

    out = spatial_attention(x, conv_weight)
    out = jax.block_until_ready(out)

    ref = _reference(x, conv_weight)
    assert out.shape == (N, 1, H, W)
    assert jnp.allclose(out, ref, atol=1e-5, rtol=1e-5), "mismatch vs reference"

    print("KERNEL_OK")
</pallas_src>

<mosaic_0001>
module attributes {stable_mosaic.version = 11 : i64} {
  func.func @_spatial_attention_kernel(%arg0: i32, %arg1: memref<1x4x256xf32, #tpu.memory_space<vmem>>, %arg2: memref<1x256xi32, #tpu.memory_space<vmem>>, %arg3: memref<1x256xi32, #tpu.memory_space<vmem>>, %arg4: memref<98xf32, #tpu.memory_space<smem>>, %arg5: memref<1x1x256xf32, #tpu.memory_space<vmem>>, %arg6: memref<2x1x512xf32, #tpu.memory_space<vmem>>, %arg7: memref<1x512xf32, #tpu.memory_space<vmem>>) attributes {dimension_semantics = [#tpu.dimension_semantics<parallel>], iteration_bounds = array<i64: 2>, scalar_prefetch = 0 : i64, scratch_operands = 2 : i64, tpu.core_type = #tpu.core_type<tc>, window_params = [{transform_indices = @transform_0, window_bounds = array<i64: 1, 4, 256>}, {pipeline_mode = #tpu.pipeline_mode<synchronous>, transform_indices = @transform_1, window_bounds = array<i64: 1, 256>}, {pipeline_mode = #tpu.pipeline_mode<synchronous>, transform_indices = @transform_2, window_bounds = array<i64: 1, 256>}, {transform_indices = @transform_3, window_bounds = array<i64: 98>}, {transform_indices = @transform_4, window_bounds = array<i64: 1, 1, 256>}]} {
    %c0 = arith.constant 0 : index
    %c0_0 = arith.constant 0 : index
    %c0_1 = arith.constant 0 : index
    %0 = vector.load %arg1[%c0, %c0_0, %c0_1] : memref<1x4x256xf32, #tpu.memory_space<vmem>>, vector<1x4x256xf32>
    %cst = arith.constant dense<0.000000e+00> : vector<1x256xf32>
    %1 = vector.multi_reduction <add>, %0, %cst [1] : vector<1x4x256xf32> to vector<1x256xf32>
    %cst_2 = arith.constant dense<0xFF800000> : vector<1x256xf32>
    %2 = vector.multi_reduction <maximumf>, %0, %cst_2 [1] : vector<1x4x256xf32> to vector<1x256xf32>
    %cst_3 = arith.constant 2.500000e-01 : f32
    %3 = vector.broadcast %cst_3 : f32 to vector<1x256xf32>
    %4 = arith.mulf %1, %3 : vector<1x256xf32>
    %c0_4 = arith.constant 0 : index
    %5 = memref.load %arg4[%c0_4] : memref<98xf32, #tpu.memory_space<smem>>
    %c1 = arith.constant 1 : index
    %6 = memref.load %arg4[%c1] : memref<98xf32, #tpu.memory_space<smem>>
    %c2 = arith.constant 2 : index
    %7 = memref.load %arg4[%c2] : memref<98xf32, #tpu.memory_space<smem>>
    %c3 = arith.constant 3 : index
    %8 = memref.load %arg4[%c3] : memref<98xf32, #tpu.memory_space<smem>>
    %c4 = arith.constant 4 : index
    %9 = memref.load %arg4[%c4] : memref<98xf32, #tpu.memory_space<smem>>
    %c5 = arith.constant 5 : index
    %10 = memref.load %arg4[%c5] : memref<98xf32, #tpu.memory_space<smem>>
    %c6 = arith.constant 6 : index
    %11 = memref.load %arg4[%c6] : memref<98xf32, #tpu.memory_space<smem>>
    %c7 = arith.constant 7 : index
    %12 = memref.load %arg4[%c7] : memref<98xf32, #tpu.memory_space<smem>>
    %c8 = arith.constant 8 : index
    %13 = memref.load %arg4[%c8] : memref<98xf32, #tpu.memory_space<smem>>
    %c9 = arith.constant 9 : index
    %14 = memref.load %arg4[%c9] : memref<98xf32, #tpu.memory_space<smem>>
    %c10 = arith.constant 10 : index
    %15 = memref.load %arg4[%c10] : memref<98xf32, #tpu.memory_space<smem>>
    %c11 = arith.constant 11 : index
    %16 = memref.load %arg4[%c11] : memref<98xf32, #tpu.memory_space<smem>>
    %c12 = arith.constant 12 : index
    %17 = memref.load %arg4[%c12] : memref<98xf32, #tpu.memory_space<smem>>
    %c13 = arith.constant 13 : index
    %18 = memref.load %arg4[%c13] : memref<98xf32, #tpu.memory_space<smem>>
    %c14 = arith.constant 14 : index
    %19 = memref.load %arg4[%c14] : memref<98xf32, #tpu.memory_space<smem>>
    %c15 = arith.constant 15 : index
    %20 = memref.load %arg4[%c15] : memref<98xf32, #tpu.memory_space<smem>>
    %c16 = arith.constant 16 : index
    %21 = memref.load %arg4[%c16] : memref<98xf32, #tpu.memory_space<smem>>
    %c17 = arith.constant 17 : index
    %22 = memref.load %arg4[%c17] : memref<98xf32, #tpu.memory_space<smem>>
    %c18 = arith.constant 18 : index
    %23 = memref.load %arg4[%c18] : memref<98xf32, #tpu.memory_space<smem>>
    %c19 = arith.constant 19 : index
    %24 = memref.load %arg4[%c19] : memref<98xf32, #tpu.memory_space<smem>>
    %c20 = arith.constant 20 : index
    %25 = memref.load %arg4[%c20] : memref<98xf32, #tpu.memory_space<smem>>
    %c21 = arith.constant 21 : index
    %26 = memref.load %arg4[%c21] : memref<98xf32, #tpu.memory_space<smem>>
    %c22 = arith.constant 22 : index
    %27 = memref.load %arg4[%c22] : memref<98xf32, #tpu.memory_space<smem>>
    %c23 = arith.constant 23 : index
    %28 = memref.load %arg4[%c23] : memref<98xf32, #tpu.memory_space<smem>>
    %c24 = arith.constant 24 : index
    %29 = memref.load %arg4[%c24] : memref<98xf32, #tpu.memory_space<smem>>
    %c25 = arith.constant 25 : index
    %30 = memref.load %arg4[%c25] : memref<98xf32, #tpu.memory_space<smem>>
    %c26 = arith.constant 26 : index
    %31 = memref.load %arg4[%c26] : memref<98xf32, #tpu.memory_space<smem>>
    %c27 = arith.constant 27 : index
    %32 = memref.load %arg4[%c27] : memref<98xf32, #tpu.memory_space<smem>>
    %c28 = arith.constant 28 : index
    %33 = memref.load %arg4[%c28] : memref<98xf32, #tpu.memory_space<smem>>
    %c29 = arith.constant 29 : index
    %34 = memref.load %arg4[%c29] : memref<98xf32, #tpu.memory_space<smem>>
    %c30 = arith.constant 30 : index
    %35 = memref.load %arg4[%c30] : memref<98xf32, #tpu.memory_space<smem>>
    %c31 = arith.constant 31 : index
    %36 = memref.load %arg4[%c31] : memref<98xf32, #tpu.memory_space<smem>>
    %c32 = arith.constant 32 : index
    %37 = memref.load %arg4[%c32] : memref<98xf32, #tpu.memory_space<smem>>
    %c33 = arith.constant 33 : index
    %38 = memref.load %arg4[%c33] : memref<98xf32, #tpu.memory_space<smem>>
    %c34 = arith.constant 34 : index
    %39 = memref.load %arg4[%c34] : memref<98xf32, #tpu.memory_space<smem>>
    %c35 = arith.constant 35 : index
    %40 = memref.load %arg4[%c35] : memref<98xf32, #tpu.memory_space<smem>>
    %c36 = arith.constant 36 : index
    %41 = memref.load %arg4[%c36] : memref<98xf32, #tpu.memory_space<smem>>
    %c37 = arith.constant 37 : index
    %42 = memref.load %arg4[%c37] : memref<98xf32, #tpu.memory_space<smem>>
    %c38 = arith.constant 38 : index
    %43 = memref.load %arg4[%c38] : memref<98xf32, #tpu.memory_space<smem>>
    %c39 = arith.constant 39 : index
    %44 = memref.load %arg4[%c39] : memref<98xf32, #tpu.memory_space<smem>>
    %c40 = arith.constant 40 : index
    %45 = memref.load %arg4[%c40] : memref<98xf32, #tpu.memory_space<smem>>
    %c41 = arith.constant 41 : index
    %46 = memref.load %arg4[%c41] : memref<98xf32, #tpu.memory_space<smem>>
    %c42 = arith.constant 42 : index
    %47 = memref.load %arg4[%c42] : memref<98xf32, #tpu.memory_space<smem>>
    %c43 = arith.constant 43 : index
    %48 = memref.load %arg4[%c43] : memref<98xf32, #tpu.memory_space<smem>>
    %c44 = arith.constant 44 : index
    %49 = memref.load %arg4[%c44] : memref<98xf32, #tpu.memory_space<smem>>
    %c45 = arith.constant 45 : index
    %50 = memref.load %arg4[%c45] : memref<98xf32, #tpu.memory_space<smem>>
    %c46 = arith.constant 46 : index
    %51 = memref.load %arg4[%c46] : memref<98xf32, #tpu.memory_space<smem>>
    %c47 = arith.constant 47 : index
    %52 = memref.load %arg4[%c47] : memref<98xf32, #tpu.memory_space<smem>>
    %c48 = arith.constant 48 : index
    %53 = memref.load %arg4[%c48] : memref<98xf32, #tpu.memory_space<smem>>
    %c49 = arith.constant 49 : index
    %54 = memref.load %arg4[%c49] : memref<98xf32, #tpu.memory_space<smem>>
    %c50 = arith.constant 50 : index
    %55 = memref.load %arg4[%c50] : memref<98xf32, #tpu.memory_space<smem>>
    %c51 = arith.constant 51 : index
    %56 = memref.load %arg4[%c51] : memref<98xf32, #tpu.memory_space<smem>>
    %c52 = arith.constant 52 : index
    %57 = memref.load %arg4[%c52] : memref<98xf32, #tpu.memory_space<smem>>
    %c53 = arith.constant 53 : index
    %58 = memref.load %arg4[%c53] : memref<98xf32, #tpu.memory_space<smem>>
    %c54 = arith.constant 54 : index
    %59 = memref.load %arg4[%c54] : memref<98xf32, #tpu.memory_space<smem>>
    %c55 = arith.constant 55 : index
    %60 = memref.load %arg4[%c55] : memref<98xf32, #tpu.memory_space<smem>>
    %c56 = arith.constant 56 : index
    %61 = memref.load %arg4[%c56] : memref<98xf32, #tpu.memory_space<smem>>
    %c57 = arith.constant 57 : index
    %62 = memref.load %arg4[%c57] : memref<98xf32, #tpu.memory_space<smem>>
    %c58 = arith.constant 58 : index
    %63 = memref.load %arg4[%c58] : memref<98xf32, #tpu.memory_space<smem>>
    %c59 = arith.constant 59 : index
    %64 = memref.load %arg4[%c59] : memref<98xf32, #tpu.memory_space<smem>>
    %c60 = arith.constant 60 : index
    %65 = memref.load %arg4[%c60] : memref<98xf32, #tpu.memory_space<smem>>
    %c61 = arith.constant 61 : index
    %66 = memref.load %arg4[%c61] : memref<98xf32, #tpu.memory_space<smem>>
    %c62 = arith.constant 62 : index
    %67 = memref.load %arg4[%c62] : memref<98xf32, #tpu.memory_space<smem>>
    %c63 = arith.constant 63 : index
    %68 = memref.load %arg4[%c63] : memref<98xf32, #tpu.memory_space<smem>>
    %c64 = arith.constant 64 : index
    %69 = memref.load %arg4[%c64] : memref<98xf32, #tpu.memory_space<smem>>
    %c65 = arith.constant 65 : index
    %70 = memref.load %arg4[%c65] : memref<98xf32, #tpu.memory_space<smem>>
    %c66 = arith.constant 66 : index
    %71 = memref.load %arg4[%c66] : memref<98xf32, #tpu.memory_space<smem>>
    %c67 = arith.constant 67 : index
    %72 = memref.load %arg4[%c67] : memref<98xf32, #tpu.memory_space<smem>>
    %c68 = arith.constant 68 : index
    %73 = memref.load %arg4[%c68] : memref<98xf32, #tpu.memory_space<smem>>
    %c69 = arith.constant 69 : index
    %74 = memref.load %arg4[%c69] : memref<98xf32, #tpu.memory_space<smem>>
    %c70 = arith.constant 70 : index
    %75 = memref.load %arg4[%c70] : memref<98xf32, #tpu.memory_space<smem>>
    %c71 = arith.constant 71 : index
    %76 = memref.load %arg4[%c71] : memref<98xf32, #tpu.memory_space<smem>>
    %c72 = arith.constant 72 : index
    %77 = memref.load %arg4[%c72] : memref<98xf32, #tpu.memory_space<smem>>
    %c73 = arith.constant 73 : index
    %78 = memref.load %arg4[%c73] : memref<98xf32, #tpu.memory_space<smem>>
    %c74 = arith.constant 74 : index
    %79 = memref.load %arg4[%c74] : memref<98xf32, #tpu.memory_space<smem>>
    %c75 = arith.constant 75 : index
    %80 = memref.load %arg4[%c75] : memref<98xf32, #tpu.memory_space<smem>>
    %c76 = arith.constant 76 : index
    %81 = memref.load %arg4[%c76] : memref<98xf32, #tpu.memory_space<smem>>
    %c77 = arith.constant 77 : index
    %82 = memref.load %arg4[%c77] : memref<98xf32, #tpu.memory_space<smem>>
    %c78 = arith.constant 78 : index
    %83 = memref.load %arg4[%c78] : memref<98xf32, #tpu.memory_space<smem>>
    %c79 = arith.constant 79 : index
    %84 = memref.load %arg4[%c79] : memref<98xf32, #tpu.memory_space<smem>>
    %c80 = arith.constant 80 : index
    %85 = memref.load %arg4[%c80] : memref<98xf32, #tpu.memory_space<smem>>
    %c81 = arith.constant 81 : index
    %86 = memref.load %arg4[%c81] : memref<98xf32, #tpu.memory_space<smem>>
    %c82 = arith.constant 82 : index
    %87 = memref.load %arg4[%c82] : memref<98xf32, #tpu.memory_space<smem>>
    %c83 = arith.constant 83 : index
    %88 = memref.load %arg4[%c83] : memref<98xf32, #tpu.memory_space<smem>>
    %c84 = arith.constant 84 : index
    %89 = memref.load %arg4[%c84] : memref<98xf32, #tpu.memory_space<smem>>
    %c85 = arith.constant 85 : index
    %90 = memref.load %arg4[%c85] : memref<98xf32, #tpu.memory_space<smem>>
    %c86 = arith.constant 86 : index
    %91 = memref.load %arg4[%c86] : memref<98xf32, #tpu.memory_space<smem>>
    %c87 = arith.constant 87 : index
    %92 = memref.load %arg4[%c87] : memref<98xf32, #tpu.memory_space<smem>>
    %c88 = arith.constant 88 : index
    %93 = memref.load %arg4[%c88] : memref<98xf32, #tpu.memory_space<smem>>
    %c89 = arith.constant 89 : index
    %94 = memref.load %arg4[%c89] : memref<98xf32, #tpu.memory_space<smem>>
    %c90 = arith.constant 90 : index
    %95 = memref.load %arg4[%c90] : memref<98xf32, #tpu.memory_space<smem>>
    %c91 = arith.constant 91 : index
    %96 = memref.load %arg4[%c91] : memref<98xf32, #tpu.memory_space<smem>>
    %c92 = arith.constant 92 : index
    %97 = memref.load %arg4[%c92] : memref<98xf32, #tpu.memory_space<smem>>
    %c93 = arith.constant 93 : index
    %98 = memref.load %arg4[%c93] : memref<98xf32, #tpu.memory_space<smem>>
    %c94 = arith.constant 94 : index
    %99 = memref.load %arg4[%c94] : memref<98xf32, #tpu.memory_space<smem>>
    %c95 = arith.constant 95 : index
    %100 = memref.load %arg4[%c95] : memref<98xf32, #tpu.memory_space<smem>>
    %c96 = arith.constant 96 : index
    %101 = memref.load %arg4[%c96] : memref<98xf32, #tpu.memory_space<smem>>
    %c97 = arith.constant 97 : index
    %102 = memref.load %arg4[%c97] : memref<98xf32, #tpu.memory_space<smem>>
    %c0_5 = arith.constant 0 : index
    %c0_6 = arith.constant 0 : index
    %103 = vector.load %arg2[%c0_5, %c0_6] : memref<1x256xi32, #tpu.memory_space<vmem>>, vector<1x256xi32>
    %c0_7 = arith.constant 0 : index
    %c0_8 = arith.constant 0 : index
    %104 = vector.load %arg3[%c0_7, %c0_8] : memref<1x256xi32, #tpu.memory_space<vmem>>, vector<1x256xi32>
    %c-3_i32 = arith.constant -3 : i32
    %105 = vector.broadcast %c-3_i32 : i32 to vector<1x256xi32>
    %106 = arith.addi %103, %105 : vector<1x256xi32>
    %c0_i32 = arith.constant 0 : i32
    %107 = vector.broadcast %c0_i32 : i32 to vector<1x256xi32>
    %108 = arith.cmpi sge, %106, %107 : vector<1x256xi32>
    %c-3_i32_9 = arith.constant -3 : i32
    %109 = vector.broadcast %c-3_i32_9 : i32 to vector<1x256xi32>
    %110 = arith.addi %103, %109 : vector<1x256xi32>
    %c16_i32 = arith.constant 16 : i32
    %111 = vector.broadcast %c16_i32 : i32 to vector<1x256xi32>
    %112 = arith.cmpi slt, %110, %111 : vector<1x256xi32>
    %113 = arith.andi %108, %112 : vector<1x256xi1>
    %c-3_i32_10 = arith.constant -3 : i32
    %114 = vector.broadcast %c-3_i32_10 : i32 to vector<1x256xi32>
    %115 = arith.addi %104, %114 : vector<1x256xi32>
    %c0_i32_11 = arith.constant 0 : i32
    %116 = vector.broadcast %c0_i32_11 : i32 to vector<1x256xi32>
    %117 = arith.cmpi sge, %115, %116 : vector<1x256xi32>
    %c-3_i32_12 = arith.constant -3 : i32
    %118 = vector.broadcast %c-3_i32_12 : i32 to vector<1x256xi32>
    %119 = arith.addi %104, %118 : vector<1x256xi32>
    %c16_i32_13 = arith.constant 16 : i32
    %120 = vector.broadcast %c16_i32_13 : i32 to vector<1x256xi32>
    %121 = arith.cmpi slt, %119, %120 : vector<1x256xi32>
    %122 = arith.andi %117, %121 : vector<1x256xi1>
    %c-2_i32 = arith.constant -2 : i32
    %123 = vector.broadcast %c-2_i32 : i32 to vector<1x256xi32>
    %124 = arith.addi %103, %123 : vector<1x256xi32>
    %c0_i32_14 = arith.constant 0 : i32
    %125 = vector.broadcast %c0_i32_14 : i32 to vector<1x256xi32>
    %126 = arith.cmpi sge, %124, %125 : vector<1x256xi32>
    %c-2_i32_15 = arith.constant -2 : i32
    %127 = vector.broadcast %c-2_i32_15 : i32 to vector<1x256xi32>
    %128 = arith.addi %103, %127 : vector<1x256xi32>
    %c16_i32_16 = arith.constant 16 : i32
    %129 = vector.broadcast %c16_i32_16 : i32 to vector<1x256xi32>
    %130 = arith.cmpi slt, %128, %129 : vector<1x256xi32>
    %131 = arith.andi %126, %130 : vector<1x256xi1>
    %c-2_i32_17 = arith.constant -2 : i32
    %132 = vector.broadcast %c-2_i32_17 : i32 to vector<1x256xi32>
    %133 = arith.addi %104, %132 : vector<1x256xi32>
    %c0_i32_18 = arith.constant 0 : i32
    %134 = vector.broadcast %c0_i32_18 : i32 to vector<1x256xi32>
    %135 = arith.cmpi sge, %133, %134 : vector<1x256xi32>
    %c-2_i32_19 = arith.constant -2 : i32
    %136 = vector.broadcast %c-2_i32_19 : i32 to vector<1x256xi32>
    %137 = arith.addi %104, %136 : vector<1x256xi32>
    %c16_i32_20 = arith.constant 16 : i32
    %138 = vector.broadcast %c16_i32_20 : i32 to vector<1x256xi32>
    %139 = arith.cmpi slt, %137, %138 : vector<1x256xi32>
    %140 = arith.andi %135, %139 : vector<1x256xi1>
    %c-1_i32 = arith.constant -1 : i32
    %141 = vector.broadcast %c-1_i32 : i32 to vector<1x256xi32>
    %142 = arith.addi %103, %141 : vector<1x256xi32>
    %c0_i32_21 = arith.constant 0 : i32
    %143 = vector.broadcast %c0_i32_21 : i32 to vector<1x256xi32>
    %144 = arith.cmpi sge, %142, %143 : vector<1x256xi32>
    %c-1_i32_22 = arith.constant -1 : i32
    %145 = vector.broadcast %c-1_i32_22 : i32 to vector<1x256xi32>
    %146 = arith.addi %103, %145 : vector<1x256xi32>
    %c16_i32_23 = arith.constant 16 : i32
    %147 = vector.broadcast %c16_i32_23 : i32 to vector<1x256xi32>
    %148 = arith.cmpi slt, %146, %147 : vector<1x256xi32>
    %149 = arith.andi %144, %148 : vector<1x256xi1>
    %c-1_i32_24 = arith.constant -1 : i32
    %150 = vector.broadcast %c-1_i32_24 : i32 to vector<1x256xi32>
    %151 = arith.addi %104, %150 : vector<1x256xi32>
    %c0_i32_25 = arith.constant 0 : i32
    %152 = vector.broadcast %c0_i32_25 : i32 to vector<1x256xi32>
    %153 = arith.cmpi sge, %151, %152 : vector<1x256xi32>
    %c-1_i32_26 = arith.constant -1 : i32
    %154 = vector.broadcast %c-1_i32_26 : i32 to vector<1x256xi32>
    %155 = arith.addi %104, %154 : vector<1x256xi32>
    %c16_i32_27 = arith.constant 16 : i32
    %156 = vector.broadcast %c16_i32_27 : i32 to vector<1x256xi32>
    %157 = arith.cmpi slt, %155, %156 : vector<1x256xi32>
    %158 = arith.andi %153, %157 : vector<1x256xi1>
    %c1_i32 = arith.constant 1 : i32
    %159 = vector.broadcast %c1_i32 : i32 to vector<1x256xi32>
    %160 = arith.addi %103, %159 : vector<1x256xi32>
    %c0_i32_28 = arith.constant 0 : i32
    %161 = vector.broadcast %c0_i32_28 : i32 to vector<1x256xi32>
    %162 = arith.cmpi sge, %160, %161 : vector<1x256xi32>
    %c1_i32_29 = arith.constant 1 : i32
    %163 = vector.broadcast %c1_i32_29 : i32 to vector<1x256xi32>
    %164 = arith.addi %103, %163 : vector<1x256xi32>
    %c16_i32_30 = arith.constant 16 : i32
    %165 = vector.broadcast %c16_i32_30 : i32 to vector<1x256xi32>
    %166 = arith.cmpi slt, %164, %165 : vector<1x256xi32>
    %167 = arith.andi %162, %166 : vector<1x256xi1>
    %c1_i32_31 = arith.constant 1 : i32
    %168 = vector.broadcast %c1_i32_31 : i32 to vector<1x256xi32>
    %169 = arith.addi %104, %168 : vector<1x256xi32>
    %c0_i32_32 = arith.constant 0 : i32
    %170 = vector.broadcast %c0_i32_32 : i32 to vector<1x256xi32>
    %171 = arith.cmpi sge, %169, %170 : vector<1x256xi32>
    %c1_i32_33 = arith.constant 1 : i32
    %172 = vector.broadcast %c1_i32_33 : i32 to vector<1x256xi32>
    %173 = arith.addi %104, %172 : vector<1x256xi32>
    %c16_i32_34 = arith.constant 16 : i32
    %174 = vector.broadcast %c16_i32_34 : i32 to vector<1x256xi32>
    %175 = arith.cmpi slt, %173, %174 : vector<1x256xi32>
    %176 = arith.andi %171, %175 : vector<1x256xi1>
    %c2_i32 = arith.constant 2 : i32
    %177 = vector.broadcast %c2_i32 : i32 to vector<1x256xi32>
    %178 = arith.addi %103, %177 : vector<1x256xi32>
    %c0_i32_35 = arith.constant 0 : i32
    %179 = vector.broadcast %c0_i32_35 : i32 to vector<1x256xi32>
    %180 = arith.cmpi sge, %178, %179 : vector<1x256xi32>
    %c2_i32_36 = arith.constant 2 : i32
    %181 = vector.broadcast %c2_i32_36 : i32 to vector<1x256xi32>
    %182 = arith.addi %103, %181 : vector<1x256xi32>
    %c16_i32_37 = arith.constant 16 : i32
    %183 = vector.broadcast %c16_i32_37 : i32 to vector<1x256xi32>
    %184 = arith.cmpi slt, %182, %183 : vector<1x256xi32>
    %185 = arith.andi %180, %184 : vector<1x256xi1>
    %c2_i32_38 = arith.constant 2 : i32
    %186 = vector.broadcast %c2_i32_38 : i32 to vector<1x256xi32>
    %187 = arith.addi %104, %186 : vector<1x256xi32>
    %c0_i32_39 = arith.constant 0 : i32
    %188 = vector.broadcast %c0_i32_39 : i32 to vector<1x256xi32>
    %189 = arith.cmpi sge, %187, %188 : vector<1x256xi32>
    %c2_i32_40 = arith.constant 2 : i32
    %190 = vector.broadcast %c2_i32_40 : i32 to vector<1x256xi32>
    %191 = arith.addi %104, %190 : vector<1x256xi32>
    %c16_i32_41 = arith.constant 16 : i32
    %192 = vector.broadcast %c16_i32_41 : i32 to vector<1x256xi32>
    %193 = arith.cmpi slt, %191, %192 : vector<1x256xi32>
    %194 = arith.andi %189, %193 : vector<1x256xi1>
    %c3_i32 = arith.constant 3 : i32
    %195 = vector.broadcast %c3_i32 : i32 to vector<1x256xi32>
    %196 = arith.addi %103, %195 : vector<1x256xi32>
    %c0_i32_42 = arith.constant 0 : i32
    %197 = vector.broadcast %c0_i32_42 : i32 to vector<1x256xi32>
    %198 = arith.cmpi sge, %196, %197 : vector<1x256xi32>
    %c3_i32_43 = arith.constant 3 : i32
    %199 = vector.broadcast %c3_i32_43 : i32 to vector<1x256xi32>
    %200 = arith.addi %103, %199 : vector<1x256xi32>
    %c16_i32_44 = arith.constant 16 : i32
    %201 = vector.broadcast %c16_i32_44 : i32 to vector<1x256xi32>
    %202 = arith.cmpi slt, %200, %201 : vector<1x256xi32>
    %203 = arith.andi %198, %202 : vector<1x256xi1>
    %c3_i32_45 = arith.constant 3 : i32
    %204 = vector.broadcast %c3_i32_45 : i32 to vector<1x256xi32>
    %205 = arith.addi %104, %204 : vector<1x256xi32>
    %c0_i32_46 = arith.constant 0 : i32
    %206 = vector.broadcast %c0_i32_46 : i32 to vector<1x256xi32>
    %207 = arith.cmpi sge, %205, %206 : vector<1x256xi32>
    %c3_i32_47 = arith.constant 3 : i32
    %208 = vector.broadcast %c3_i32_47 : i32 to vector<1x256xi32>
    %209 = arith.addi %104, %208 : vector<1x256xi32>
    %c16_i32_48 = arith.constant 16 : i32
    %210 = vector.broadcast %c16_i32_48 : i32 to vector<1x256xi32>
    %211 = arith.cmpi slt, %209, %210 : vector<1x256xi32>
    %212 = arith.andi %207, %211 : vector<1x256xi1>
    %c0_49 = arith.constant 0 : index
    %c0_50 = arith.constant 0 : index
    %c128 = arith.constant 128 : index
    %213 = vector.load %arg6[%c0_49, %c0_50, %c128] : memref<2x1x512xf32, #tpu.memory_space<vmem>>, vector<1x1x256xf32>
    %214 = vector.shape_cast %213 : vector<1x1x256xf32> to vector<1x256xf32>
    %215 = vector.shape_cast %4 : vector<1x256xf32> to vector<1x1x256xf32>
    tpu.vector_store %arg6[%c0_49, %c0_50, %c128], %215 {strides = array<i32>} : memref<2x1x512xf32, #tpu.memory_space<vmem>>, vector<1x1x256xf32>,
    %c0_51 = arith.constant 0 : index
    %c0_52 = arith.constant 0 : index
    %c125 = arith.constant 125 : index
    %216 = vector.load %arg6[%c0_51, %c0_52, %c125] : memref<2x1x512xf32, #tpu.memory_space<vmem>>, vector<1x1x256xf32>
    %217 = vector.shape_cast %216 : vector<1x1x256xf32> to vector<1x256xf32>
    %cst_53 = arith.constant 0.000000e+00 : f32
    %218 = vector.broadcast %cst_53 : f32 to vector<1x256xf32>
    %219 = arith.select %113, %217, %218 : vector<1x256xi1>, vector<1x256xf32>
    %c0_54 = arith.constant 0 : index
    %c0_55 = arith.constant 0 : index
    %c126 = arith.constant 126 : index
    %220 = vector.load %arg6[%c0_54, %c0_55, %c126] : memref<2x1x512xf32, #tpu.memory_space<vmem>>, vector<1x1x256xf32>
    %221 = vector.shape_cast %220 : vector<1x1x256xf32> to vector<1x256xf32>
    %cst_56 = arith.constant 0.000000e+00 : f32
    %222 = vector.broadcast %cst_56 : f32 to vector<1x256xf32>
    %223 = arith.select %131, %221, %222 : vector<1x256xi1>, vector<1x256xf32>
    %c0_57 = arith.constant 0 : index
    %c0_58 = arith.constant 0 : index
    %c127 = arith.constant 127 : index
    %224 = vector.load %arg6[%c0_57, %c0_58, %c127] : memref<2x1x512xf32, #tpu.memory_space<vmem>>, vector<1x1x256xf32>
    %225 = vector.shape_cast %224 : vector<1x1x256xf32> to vector<1x256xf32>
    %cst_59 = arith.constant 0.000000e+00 : f32
    %226 = vector.broadcast %cst_59 : f32 to vector<1x256xf32>
    %227 = arith.select %149, %225, %226 : vector<1x256xi1>, vector<1x256xf32>
    %c0_60 = arith.constant 0 : index
    %c0_61 = arith.constant 0 : index
    %c129 = arith.constant 129 : index
    %228 = vector.load %arg6[%c0_60, %c0_61, %c129] : memref<2x1x512xf32, #tpu.memory_space<vmem>>, vector<1x1x256xf32>
    %229 = vector.shape_cast %228 : vector<1x1x256xf32> to vector<1x256xf32>
    %cst_62 = arith.constant 0.000000e+00 : f32
    %230 = vector.broadcast %cst_62 : f32 to vector<1x256xf32>
    %231 = arith.select %167, %229, %230 : vector<1x256xi1>, vector<1x256xf32>
    %c0_63 = arith.constant 0 : index
    %c0_64 = arith.constant 0 : index
    %c130 = arith.constant 130 : index
    %232 = vector.load %arg6[%c0_63, %c0_64, %c130] : memref<2x1x512xf32, #tpu.memory_space<vmem>>, vector<1x1x256xf32>
    %233 = vector.shape_cast %232 : vector<1x1x256xf32> to vector<1x256xf32>
    %cst_65 = arith.constant 0.000000e+00 : f32
    %234 = vector.broadcast %cst_65 : f32 to vector<1x256xf32>
    %235 = arith.select %185, %233, %234 : vector<1x256xi1>, vector<1x256xf32>
    %c0_66 = arith.constant 0 : index
    %c0_67 = arith.constant 0 : index
    %c131 = arith.constant 131 : index
    %236 = vector.load %arg6[%c0_66, %c0_67, %c131] : memref<2x1x512xf32, #tpu.memory_space<vmem>>, vector<1x1x256xf32>
    %237 = vector.shape_cast %236 : vector<1x1x256xf32> to vector<1x256xf32>
    %cst_68 = arith.constant 0.000000e+00 : f32
    %238 = vector.broadcast %cst_68 : f32 to vector<1x256xf32>
    %239 = arith.select %203, %237, %238 : vector<1x256xi1>, vector<1x256xf32>
    %c1_69 = arith.constant 1 : index
    %c0_70 = arith.constant 0 : index
    %c128_71 = arith.constant 128 : index
    %240 = vector.load %arg6[%c1_69, %c0_70, %c128_71] : memref<2x1x512xf32, #tpu.memory_space<vmem>>, vector<1x1x256xf32>
    %241 = vector.shape_cast %240 : vector<1x1x256xf32> to vector<1x256xf32>
    %242 = vector.shape_cast %2 : vector<1x256xf32> to vector<1x1x256xf32>
    tpu.vector_store %arg6[%c1_69, %c0_70, %c128_71], %242 {strides = array<i32>} : memref<2x1x512xf32, #tpu.memory_space<vmem>>, vector<1x1x256xf32>,
    %c1_72 = arith.constant 1 : index
    %c0_73 = arith.constant 0 : index
    %c125_74 = arith.constant 125 : index
    %243 = vector.load %arg6[%c1_72, %c0_73, %c125_74] : memref<2x1x512xf32, #tpu.memory_space<vmem>>, vector<1x1x256xf32>
    %244 = vector.shape_cast %243 : vector<1x1x256xf32> to vector<1x256xf32>
    %cst_75 = arith.constant 0.000000e+00 : f32
    %245 = vector.broadcast %cst_75 : f32 to vector<1x256xf32>
    %246 = arith.select %113, %244, %245 : vector<1x256xi1>, vector<1x256xf32>
    %c1_76 = arith.constant 1 : index
    %c0_77 = arith.constant 0 : index
    %c126_78 = arith.constant 126 : index
    %247 = vector.load %arg6[%c1_76, %c0_77, %c126_78] : memref<2x1x512xf32, #tpu.memory_space<vmem>>, vector<1x1x256xf32>
    %248 = vector.shape_cast %247 : vector<1x1x256xf32> to vector<1x256xf32>
    %cst_79 = arith.constant 0.000000e+00 : f32
    %249 = vector.broadcast %cst_79 : f32 to vector<1x256xf32>
    %250 = arith.select %131, %248, %249 : vector<1x256xi1>, vector<1x256xf32>
    %c1_80 = arith.constant 1 : index
    %c0_81 = arith.constant 0 : index
    %c127_82 = arith.constant 127 : index
    %251 = vector.load %arg6[%c1_80, %c0_81, %c127_82] : memref<2x1x512xf32, #tpu.memory_space<vmem>>, vector<1x1x256xf32>
    %252 = vector.shape_cast %251 : vector<1x1x256xf32> to vector<1x256xf32>
    %cst_83 = arith.constant 0.000000e+00 : f32
    %253 = vector.broadcast %cst_83 : f32 to vector<1x256xf32>
    %254 = arith.select %149, %252, %253 : vector<1x256xi1>, vector<1x256xf32>
    %c1_84 = arith.constant 1 : index
    %c0_85 = arith.constant 0 : index
    %c129_86 = arith.constant 129 : index
    %255 = vector.load %arg6[%c1_84, %c0_85, %c129_86] : memref<2x1x512xf32, #tpu.memory_space<vmem>>, vector<1x1x256xf32>
    %256 = vector.shape_cast %255 : vector<1x1x256xf32> to vector<1x256xf32>
    %cst_87 = arith.constant 0.000000e+00 : f32
    %257 = vector.broadcast %cst_87 : f32 to vector<1x256xf32>
    %258 = arith.select %167, %256, %257 : vector<1x256xi1>, vector<1x256xf32>
    %c1_88 = arith.constant 1 : index
    %c0_89 = arith.constant 0 : index
    %c130_90 = arith.constant 130 : index
    %259 = vector.load %arg6[%c1_88, %c0_89, %c130_90] : memref<2x1x512xf32, #tpu.memory_space<vmem>>, vector<1x1x256xf32>
    %260 = vector.shape_cast %259 : vector<1x1x256xf32> to vector<1x256xf32>
    %cst_91 = arith.constant 0.000000e+00 : f32
    %261 = vector.broadcast %cst_91 : f32 to vector<1x256xf32>
    %262 = arith.select %185, %260, %261 : vector<1x256xi1>, vector<1x256xf32>
    %c1_92 = arith.constant 1 : index
    %c0_93 = arith.constant 0 : index
    %c131_94 = arith.constant 131 : index
    %263 = vector.load %arg6[%c1_92, %c0_93, %c131_94] : memref<2x1x512xf32, #tpu.memory_space<vmem>>, vector<1x1x256xf32>
    %264 = vector.shape_cast %263 : vector<1x1x256xf32> to vector<1x256xf32>
    %cst_95 = arith.constant 0.000000e+00 : f32
    %265 = vector.broadcast %cst_95 : f32 to vector<1x256xf32>
    %266 = arith.select %203, %264, %265 : vector<1x256xi1>, vector<1x256xf32>
    %cst_96 = arith.constant 0.000000e+00 : f32
    %267 = vector.broadcast %cst_96 : f32 to vector<1x256xf32>
    %268 = vector.broadcast %5 : f32 to vector<1x256xf32>
    %269 = arith.mulf %268, %219 : vector<1x256xf32>
    %270 = arith.addf %267, %269 : vector<1x256xf32>
    %271 = vector.broadcast %6 : f32 to vector<1x256xf32>
    %272 = arith.mulf %271, %223 : vector<1x256xf32>
    %273 = arith.addf %267, %272 : vector<1x256xf32>
    %274 = vector.broadcast %7 : f32 to vector<1x256xf32>
    %275 = arith.mulf %274, %227 : vector<1x256xf32>
    %276 = arith.addf %267, %275 : vector<1x256xf32>
    %277 = vector.broadcast %8 : f32 to vector<1x256xf32>
    %278 = arith.mulf %277, %4 : vector<1x256xf32>
    %279 = arith.addf %267, %278 : vector<1x256xf32>
    %280 = vector.broadcast %9 : f32 to vector<1x256xf32>
    %281 = arith.mulf %280, %231 : vector<1x256xf32>
    %282 = arith.addf %270, %281 : vector<1x256xf32>
    %283 = vector.broadcast %10 : f32 to vector<1x256xf32>
    %284 = arith.mulf %283, %235 : vector<1x256xf32>
    %285 = arith.addf %273, %284 : vector<1x256xf32>
    %286 = vector.broadcast %11 : f32 to vector<1x256xf32>
    %287 = arith.mulf %286, %239 : vector<1x256xf32>
    %288 = arith.addf %276, %287 : vector<1x256xf32>
    %289 = vector.broadcast %54 : f32 to vector<1x256xf32>
    %290 = arith.mulf %289, %246 : vector<1x256xf32>
    %291 = arith.addf %279, %290 : vector<1x256xf32>
    %292 = vector.broadcast %55 : f32 to vector<1x256xf32>
    %293 = arith.mulf %292, %250 : vector<1x256xf32>
    %294 = arith.addf %282, %293 : vector<1x256xf32>
    %295 = vector.broadcast %56 : f32 to vector<1x256xf32>
    %296 = arith.mulf %295, %254 : vector<1x256xf32>
    %297 = arith.addf %285, %296 : vector<1x256xf32>
    %298 = vector.broadcast %57 : f32 to vector<1x256xf32>
    %299 = arith.mulf %298, %2 : vector<1x256xf32>
    %300 = arith.addf %288, %299 : vector<1x256xf32>
    %301 = vector.broadcast %58 : f32 to vector<1x256xf32>
    %302 = arith.mulf %301, %258 : vector<1x256xf32>
    %303 = arith.addf %291, %302 : vector<1x256xf32>
    %304 = vector.broadcast %59 : f32 to vector<1x256xf32>
    %305 = arith.mulf %304, %262 : vector<1x256xf32>
    %306 = arith.addf %294, %305 : vector<1x256xf32>
    %307 = vector.broadcast %60 : f32 to vector<1x256xf32>
    %308 = arith.mulf %307, %266 : vector<1x256xf32>
    %309 = arith.addf %297, %308 : vector<1x256xf32>
    %310 = arith.addf %306, %309 : vector<1x256xf32>
    %311 = arith.addf %300, %303 : vector<1x256xf32>
    %312 = arith.addf %310, %311 : vector<1x256xf32>
    %c0_97 = arith.constant 0 : index
    %c128_98 = arith.constant 128 : index
    %313 = vector.load %arg7[%c0_97, %c128_98] : memref<1x512xf32, #tpu.memory_space<vmem>>, vector<1x256xf32>
    tpu.vector_store %arg7[%c0_97, %c128_98], %312 {strides = array<i32>} : memref<1x512xf32, #tpu.memory_space<vmem>>, vector<1x256xf32>,
    %c0_99 = arith.constant 0 : index
    %c80_100 = arith.constant 80 : index
    %314 = vector.load %arg7[%c0_99, %c80_100] : memref<1x512xf32, #tpu.memory_space<vmem>>, vector<1x256xf32>
    %cst_101 = arith.constant 0.000000e+00 : f32
    %315 = vector.broadcast %cst_101 : f32 to vector<1x256xf32>
    %316 = arith.select %122, %314, %315 : vector<1x256xi1>, vector<1x256xf32>
    %317 = arith.addf %267, %316 : vector<1x256xf32>
    %318 = vector.broadcast %12 : f32 to vector<1x256xf32>
    %319 = arith.mulf %318, %219 : vector<1x256xf32>
    %320 = arith.addf %267, %319 : vector<1x256xf32>
    %321 = vector.broadcast %13 : f32 to vector<1x256xf32>
    %322 = arith.mulf %321, %223 : vector<1x256xf32>
    %323 = arith.addf %267, %322 : vector<1x256xf32>
    %324 = vector.broadcast %14 : f32 to vector<1x256xf32>
    %325 = arith.mulf %324, %227 : vector<1x256xf32>
    %326 = arith.addf %267, %325 : vector<1x256xf32>
    %327 = vector.broadcast %15 : f32 to vector<1x256xf32>
    %328 = arith.mulf %327, %4 : vector<1x256xf32>
    %329 = arith.addf %267, %328 : vector<1x256xf32>
    %330 = vector.broadcast %16 : f32 to vector<1x256xf32>
    %331 = arith.mulf %330, %231 : vector<1x256xf32>
    %332 = arith.addf %320, %331 : vector<1x256xf32>
    %333 = vector.broadcast %17 : f32 to vector<1x256xf32>
    %334 = arith.mulf %333, %235 : vector<1x256xf32>
    %335 = arith.addf %323, %334 : vector<1x256xf32>
    %336 = vector.broadcast %18 : f32 to vector<1x256xf32>
    %337 = arith.mulf %336, %239 : vector<1x256xf32>
    %338 = arith.addf %326, %337 : vector<1x256xf32>
    %339 = vector.broadcast %61 : f32 to vector<1x256xf32>
    %340 = arith.mulf %339, %246 : vector<1x256xf32>
    %341 = arith.addf %329, %340 : vector<1x256xf32>
    %342 = vector.broadcast %62 : f32 to vector<1x256xf32>
    %343 = arith.mulf %342, %250 : vector<1x256xf32>
    %344 = arith.addf %332, %343 : vector<1x256xf32>
    %345 = vector.broadcast %63 : f32 to vector<1x256xf32>
    %346 = arith.mulf %345, %254 : vector<1x256xf32>
    %347 = arith.addf %335, %346 : vector<1x256xf32>
    %348 = vector.broadcast %64 : f32 to vector<1x256xf32>
    %349 = arith.mulf %348, %2 : vector<1x256xf32>
    %350 = arith.addf %338, %349 : vector<1x256xf32>
    %351 = vector.broadcast %65 : f32 to vector<1x256xf32>
    %352 = arith.mulf %351, %258 : vector<1x256xf32>
    %353 = arith.addf %341, %352 : vector<1x256xf32>
    %354 = vector.broadcast %66 : f32 to vector<1x256xf32>
    %355 = arith.mulf %354, %262 : vector<1x256xf32>
    %356 = arith.addf %344, %355 : vector<1x256xf32>
    %357 = vector.broadcast %67 : f32 to vector<1x256xf32>
    %358 = arith.mulf %357, %266 : vector<1x256xf32>
    %359 = arith.addf %347, %358 : vector<1x256xf32>
    %360 = arith.addf %356, %359 : vector<1x256xf32>
    %361 = arith.addf %350, %353 : vector<1x256xf32>
    %362 = arith.addf %360, %361 : vector<1x256xf32>
    %c0_102 = arith.constant 0 : index
    %c128_103 = arith.constant 128 : index
    %363 = vector.load %arg7[%c0_102, %c128_103] : memref<1x512xf32, #tpu.memory_space<vmem>>, vector<1x256xf32>
    tpu.vector_store %arg7[%c0_102, %c128_103], %362 {strides = array<i32>} : memref<1x512xf32, #tpu.memory_space<vmem>>, vector<1x256xf32>,
    %c0_104 = arith.constant 0 : index
    %c96_105 = arith.constant 96 : index
    %364 = vector.load %arg7[%c0_104, %c96_105] : memref<1x512xf32, #tpu.memory_space<vmem>>, vector<1x256xf32>
    %cst_106 = arith.constant 0.000000e+00 : f32
    %365 = vector.broadcast %cst_106 : f32 to vector<1x256xf32>
    %366 = arith.select %140, %364, %365 : vector<1x256xi1>, vector<1x256xf32>
    %367 = arith.addf %267, %366 : vector<1x256xf32>
    %368 = vector.broadcast %19 : f32 to vector<1x256xf32>
    %369 = arith.mulf %368, %219 : vector<1x256xf32>
    %370 = arith.addf %267, %369 : vector<1x256xf32>
    %371 = vector.broadcast %20 : f32 to vector<1x256xf32>
    %372 = arith.mulf %371, %223 : vector<1x256xf32>
    %373 = arith.addf %267, %372 : vector<1x256xf32>
    %374 = vector.broadcast %21 : f32 to vector<1x256xf32>
    %375 = arith.mulf %374, %227 : vector<1x256xf32>
    %376 = arith.addf %267, %375 : vector<1x256xf32>
    %377 = vector.broadcast %22 : f32 to vector<1x256xf32>
    %378 = arith.mulf %377, %4 : vector<1x256xf32>
    %379 = arith.addf %267, %378 : vector<1x256xf32>
    %380 = vector.broadcast %23 : f32 to vector<1x256xf32>
    %381 = arith.mulf %380, %231 : vector<1x256xf32>
    %382 = arith.addf %370, %381 : vector<1x256xf32>
    %383 = vector.broadcast %24 : f32 to vector<1x256xf32>
    %384 = arith.mulf %383, %235 : vector<1x256xf32>
    %385 = arith.addf %373, %384 : vector<1x256xf32>
    %386 = vector.broadcast %25 : f32 to vector<1x256xf32>
    %387 = arith.mulf %386, %239 : vector<1x256xf32>
    %388 = arith.addf %376, %387 : vector<1x256xf32>
    %389 = vector.broadcast %68 : f32 to vector<1x256xf32>
    %390 = arith.mulf %389, %246 : vector<1x256xf32>
    %391 = arith.addf %379, %390 : vector<1x256xf32>
    %392 = vector.broadcast %69 : f32 to vector<1x256xf32>
    %393 = arith.mulf %392, %250 : vector<1x256xf32>
    %394 = arith.addf %382, %393 : vector<1x256xf32>
    %395 = vector.broadcast %70 : f32 to vector<1x256xf32>
    %396 = arith.mulf %395, %254 : vector<1x256xf32>
    %397 = arith.addf %385, %396 : vector<1x256xf32>
    %398 = vector.broadcast %71 : f32 to vector<1x256xf32>
    %399 = arith.mulf %398, %2 : vector<1x256xf32>
    %400 = arith.addf %388, %399 : vector<1x256xf32>
    %401 = vector.broadcast %72 : f32 to vector<1x256xf32>
    %402 = arith.mulf %401, %258 : vector<1x256xf32>
    %403 = arith.addf %391, %402 : vector<1x256xf32>
    %404 = vector.broadcast %73 : f32 to vector<1x256xf32>
    %405 = arith.mulf %404, %262 : vector<1x256xf32>
    %406 = arith.addf %394, %405 : vector<1x256xf32>
    %407 = vector.broadcast %74 : f32 to vector<1x256xf32>
    %408 = arith.mulf %407, %266 : vector<1x256xf32>
    %409 = arith.addf %397, %408 : vector<1x256xf32>
    %410 = arith.addf %406, %409 : vector<1x256xf32>
    %411 = arith.addf %400, %403 : vector<1x256xf32>
    %412 = arith.addf %410, %411 : vector<1x256xf32>
    %c0_107 = arith.constant 0 : index
    %c128_108 = arith.constant 128 : index
    %413 = vector.load %arg7[%c0_107, %c128_108] : memref<1x512xf32, #tpu.memory_space<vmem>>, vector<1x256xf32>
    tpu.vector_store %arg7[%c0_107, %c128_108], %412 {strides = array<i32>} : memref<1x512xf32, #tpu.memory_space<vmem>>, vector<1x256xf32>,
    %c0_109 = arith.constant 0 : index
    %c112 = arith.constant 112 : index
    %414 = vector.load %arg7[%c0_109, %c112] : memref<1x512xf32, #tpu.memory_space<vmem>>, vector<1x256xf32>
    %cst_110 = arith.constant 0.000000e+00 : f32
    %415 = vector.broadcast %cst_110 : f32 to vector<1x256xf32>
    %416 = arith.select %158, %414, %415 : vector<1x256xi1>, vector<1x256xf32>
    %417 = arith.addf %317, %416 : vector<1x256xf32>
    %418 = vector.broadcast %26 : f32 to vector<1x256xf32>
    %419 = arith.mulf %418, %219 : vector<1x256xf32>
    %420 = arith.addf %267, %419 : vector<1x256xf32>
    %421 = vector.broadcast %27 : f32 to vector<1x256xf32>
    %422 = arith.mulf %421, %223 : vector<1x256xf32>
    %423 = arith.addf %267, %422 : vector<1x256xf32>
    %424 = vector.broadcast %28 : f32 to vector<1x256xf32>
    %425 = arith.mulf %424, %227 : vector<1x256xf32>
    %426 = arith.addf %267, %425 : vector<1x256xf32>
    %427 = vector.broadcast %29 : f32 to vector<1x256xf32>
    %428 = arith.mulf %427, %4 : vector<1x256xf32>
    %429 = arith.addf %267, %428 : vector<1x256xf32>
    %430 = vector.broadcast %30 : f32 to vector<1x256xf32>
    %431 = arith.mulf %430, %231 : vector<1x256xf32>
    %432 = arith.addf %420, %431 : vector<1x256xf32>
    %433 = vector.broadcast %31 : f32 to vector<1x256xf32>
    %434 = arith.mulf %433, %235 : vector<1x256xf32>
    %435 = arith.addf %423, %434 : vector<1x256xf32>
    %436 = vector.broadcast %32 : f32 to vector<1x256xf32>
    %437 = arith.mulf %436, %239 : vector<1x256xf32>
    %438 = arith.addf %426, %437 : vector<1x256xf32>
    %439 = vector.broadcast %75 : f32 to vector<1x256xf32>
    %440 = arith.mulf %439, %246 : vector<1x256xf32>
    %441 = arith.addf %429, %440 : vector<1x256xf32>
    %442 = vector.broadcast %76 : f32 to vector<1x256xf32>
    %443 = arith.mulf %442, %250 : vector<1x256xf32>
    %444 = arith.addf %432, %443 : vector<1x256xf32>
    %445 = vector.broadcast %77 : f32 to vector<1x256xf32>
    %446 = arith.mulf %445, %254 : vector<1x256xf32>
    %447 = arith.addf %435, %446 : vector<1x256xf32>
    %448 = vector.broadcast %78 : f32 to vector<1x256xf32>
    %449 = arith.mulf %448, %2 : vector<1x256xf32>
    %450 = arith.addf %438, %449 : vector<1x256xf32>
    %451 = vector.broadcast %79 : f32 to vector<1x256xf32>
    %452 = arith.mulf %451, %258 : vector<1x256xf32>
    %453 = arith.addf %441, %452 : vector<1x256xf32>
    %454 = vector.broadcast %80 : f32 to vector<1x256xf32>
    %455 = arith.mulf %454, %262 : vector<1x256xf32>
    %456 = arith.addf %444, %455 : vector<1x256xf32>
    %457 = vector.broadcast %81 : f32 to vector<1x256xf32>
    %458 = arith.mulf %457, %266 : vector<1x256xf32>
    %459 = arith.addf %447, %458 : vector<1x256xf32>
    %460 = arith.addf %456, %459 : vector<1x256xf32>
    %461 = arith.addf %450, %453 : vector<1x256xf32>
    %462 = arith.addf %460, %461 : vector<1x256xf32>
    %463 = arith.addf %367, %462 : vector<1x256xf32>
    %464 = vector.broadcast %33 : f32 to vector<1x256xf32>
    %465 = arith.mulf %464, %219 : vector<1x256xf32>
    %466 = arith.addf %267, %465 : vector<1x256xf32>
    %467 = vector.broadcast %34 : f32 to vector<1x256xf32>
    %468 = arith.mulf %467, %223 : vector<1x256xf32>
    %469 = arith.addf %267, %468 : vector<1x256xf32>
    %470 = vector.broadcast %35 : f32 to vector<1x256xf32>
    %471 = arith.mulf %470, %227 : vector<1x256xf32>
    %472 = arith.addf %267, %471 : vector<1x256xf32>
    %473 = vector.broadcast %36 : f32 to vector<1x256xf32>
    %474 = arith.mulf %473, %4 : vector<1x256xf32>
    %475 = arith.addf %267, %474 : vector<1x256xf32>
    %476 = vector.broadcast %37 : f32 to vector<1x256xf32>
    %477 = arith.mulf %476, %231 : vector<1x256xf32>
    %478 = arith.addf %466, %477 : vector<1x256xf32>
    %479 = vector.broadcast %38 : f32 to vector<1x256xf32>
    %480 = arith.mulf %479, %235 : vector<1x256xf32>
    %481 = arith.addf %469, %480 : vector<1x256xf32>
    %482 = vector.broadcast %39 : f32 to vector<1x256xf32>
    %483 = arith.mulf %482, %239 : vector<1x256xf32>
    %484 = arith.addf %472, %483 : vector<1x256xf32>
    %485 = vector.broadcast %82 : f32 to vector<1x256xf32>
    %486 = arith.mulf %485, %246 : vector<1x256xf32>
    %487 = arith.addf %475, %486 : vector<1x256xf32>
    %488 = vector.broadcast %83 : f32 to vector<1x256xf32>
    %489 = arith.mulf %488, %250 : vector<1x256xf32>
    %490 = arith.addf %478, %489 : vector<1x256xf32>
    %491 = vector.broadcast %84 : f32 to vector<1x256xf32>
    %492 = arith.mulf %491, %254 : vector<1x256xf32>
    %493 = arith.addf %481, %492 : vector<1x256xf32>
    %494 = vector.broadcast %85 : f32 to vector<1x256xf32>
    %495 = arith.mulf %494, %2 : vector<1x256xf32>
    %496 = arith.addf %484, %495 : vector<1x256xf32>
    %497 = vector.broadcast %86 : f32 to vector<1x256xf32>
    %498 = arith.mulf %497, %258 : vector<1x256xf32>
    %499 = arith.addf %487, %498 : vector<1x256xf32>
    %500 = vector.broadcast %87 : f32 to vector<1x256xf32>
    %501 = arith.mulf %500, %262 : vector<1x256xf32>
    %502 = arith.addf %490, %501 : vector<1x256xf32>
    %503 = vector.broadcast %88 : f32 to vector<1x256xf32>
    %504 = arith.mulf %503, %266 : vector<1x256xf32>
    %505 = arith.addf %493, %504 : vector<1x256xf32>
    %506 = arith.addf %502, %505 : vector<1x256xf32>
    %507 = arith.addf %496, %499 : vector<1x256xf32>
    %508 = arith.addf %506, %507 : vector<1x256xf32>
    %c0_111 = arith.constant 0 : index
    %c128_112 = arith.constant 128 : index
    %509 = vector.load %arg7[%c0_111, %c128_112] : memref<1x512xf32, #tpu.memory_space<vmem>>, vector<1x256xf32>
    tpu.vector_store %arg7[%c0_111, %c128_112], %508 {strides = array<i32>} : memref<1x512xf32, #tpu.memory_space<vmem>>, vector<1x256xf32>,
    %c0_113 = arith.constant 0 : index
    %c144 = arith.constant 144 : index
    %510 = vector.load %arg7[%c0_113, %c144] : memref<1x512xf32, #tpu.memory_space<vmem>>, vector<1x256xf32>
    %cst_114 = arith.constant 0.000000e+00 : f32
    %511 = vector.broadcast %cst_114 : f32 to vector<1x256xf32>
    %512 = arith.select %176, %510, %511 : vector<1x256xi1>, vector<1x256xf32>
    %513 = arith.addf %417, %512 : vector<1x256xf32>
    %514 = vector.broadcast %40 : f32 to vector<1x256xf32>
    %515 = arith.mulf %514, %219 : vector<1x256xf32>
    %516 = arith.addf %267, %515 : vector<1x256xf32>
    %517 = vector.broadcast %41 : f32 to vector<1x256xf32>
    %518 = arith.mulf %517, %223 : vector<1x256xf32>
    %519 = arith.addf %267, %518 : vector<1x256xf32>
    %520 = vector.broadcast %42 : f32 to vector<1x256xf32>
    %521 = arith.mulf %520, %227 : vector<1x256xf32>
    %522 = arith.addf %267, %521 : vector<1x256xf32>
    %523 = vector.broadcast %43 : f32 to vector<1x256xf32>
    %524 = arith.mulf %523, %4 : vector<1x256xf32>
    %525 = arith.addf %267, %524 : vector<1x256xf32>
    %526 = vector.broadcast %44 : f32 to vector<1x256xf32>
    %527 = arith.mulf %526, %231 : vector<1x256xf32>
    %528 = arith.addf %516, %527 : vector<1x256xf32>
    %529 = vector.broadcast %45 : f32 to vector<1x256xf32>
    %530 = arith.mulf %529, %235 : vector<1x256xf32>
    %531 = arith.addf %519, %530 : vector<1x256xf32>
    %532 = vector.broadcast %46 : f32 to vector<1x256xf32>
    %533 = arith.mulf %532, %239 : vector<1x256xf32>
    %534 = arith.addf %522, %533 : vector<1x256xf32>
    %535 = vector.broadcast %89 : f32 to vector<1x256xf32>
    %536 = arith.mulf %535, %246 : vector<1x256xf32>
    %537 = arith.addf %525, %536 : vector<1x256xf32>
    %538 = vector.broadcast %90 : f32 to vector<1x256xf32>
    %539 = arith.mulf %538, %250 : vector<1x256xf32>
    %540 = arith.addf %528, %539 : vector<1x256xf32>
    %541 = vector.broadcast %91 : f32 to vector<1x256xf32>
    %542 = arith.mulf %541, %254 : vector<1x256xf32>
    %543 = arith.addf %531, %542 : vector<1x256xf32>
    %544 = vector.broadcast %92 : f32 to vector<1x256xf32>
    %545 = arith.mulf %544, %2 : vector<1x256xf32>
    %546 = arith.addf %534, %545 : vector<1x256xf32>
    %547 = vector.broadcast %93 : f32 to vector<1x256xf32>
    %548 = arith.mulf %547, %258 : vector<1x256xf32>
    %549 = arith.addf %537, %548 : vector<1x256xf32>
    %550 = vector.broadcast %94 : f32 to vector<1x256xf32>
    %551 = arith.mulf %550, %262 : vector<1x256xf32>
    %552 = arith.addf %540, %551 : vector<1x256xf32>
    %553 = vector.broadcast %95 : f32 to vector<1x256xf32>
    %554 = arith.mulf %553, %266 : vector<1x256xf32>
    %555 = arith.addf %543, %554 : vector<1x256xf32>
    %556 = arith.addf %552, %555 : vector<1x256xf32>
    %557 = arith.addf %546, %549 : vector<1x256xf32>
    %558 = arith.addf %556, %557 : vector<1x256xf32>
    %c0_115 = arith.constant 0 : index
    %c128_116 = arith.constant 128 : index
    %559 = vector.load %arg7[%c0_115, %c128_116] : memref<1x512xf32, #tpu.memory_space<vmem>>, vector<1x256xf32>
    tpu.vector_store %arg7[%c0_115, %c128_116], %558 {strides = array<i32>} : memref<1x512xf32, #tpu.memory_space<vmem>>, vector<1x256xf32>,
    %c0_117 = arith.constant 0 : index
    %c160 = arith.constant 160 : index
    %560 = vector.load %arg7[%c0_117, %c160] : memref<1x512xf32, #tpu.memory_space<vmem>>, vector<1x256xf32>
    %cst_118 = arith.constant 0.000000e+00 : f32
    %561 = vector.broadcast %cst_118 : f32 to vector<1x256xf32>
    %562 = arith.select %194, %560, %561 : vector<1x256xi1>, vector<1x256xf32>
    %563 = arith.addf %463, %562 : vector<1x256xf32>
    %564 = vector.broadcast %47 : f32 to vector<1x256xf32>
    %565 = arith.mulf %564, %219 : vector<1x256xf32>
    %566 = arith.addf %267, %565 : vector<1x256xf32>
    %567 = vector.broadcast %48 : f32 to vector<1x256xf32>
    %568 = arith.mulf %567, %223 : vector<1x256xf32>
    %569 = arith.addf %267, %568 : vector<1x256xf32>
    %570 = vector.broadcast %49 : f32 to vector<1x256xf32>
    %571 = arith.mulf %570, %227 : vector<1x256xf32>
    %572 = arith.addf %267, %571 : vector<1x256xf32>
    %573 = vector.broadcast %50 : f32 to vector<1x256xf32>
    %574 = arith.mulf %573, %4 : vector<1x256xf32>
    %575 = arith.addf %267, %574 : vector<1x256xf32>
    %576 = vector.broadcast %51 : f32 to vector<1x256xf32>
    %577 = arith.mulf %576, %231 : vector<1x256xf32>
    %578 = arith.addf %566, %577 : vector<1x256xf32>
    %579 = vector.broadcast %52 : f32 to vector<1x256xf32>
    %580 = arith.mulf %579, %235 : vector<1x256xf32>
    %581 = arith.addf %569, %580 : vector<1x256xf32>
    %582 = vector.broadcast %53 : f32 to vector<1x256xf32>
    %583 = arith.mulf %582, %239 : vector<1x256xf32>
    %584 = arith.addf %572, %583 : vector<1x256xf32>
    %585 = vector.broadcast %96 : f32 to vector<1x256xf32>
    %586 = arith.mulf %585, %246 : vector<1x256xf32>
    %587 = arith.addf %575, %586 : vector<1x256xf32>
    %588 = vector.broadcast %97 : f32 to vector<1x256xf32>
    %589 = arith.mulf %588, %250 : vector<1x256xf32>
    %590 = arith.addf %578, %589 : vector<1x256xf32>
    %591 = vector.broadcast %98 : f32 to vector<1x256xf32>
    %592 = arith.mulf %591, %254 : vector<1x256xf32>
    %593 = arith.addf %581, %592 : vector<1x256xf32>
    %594 = vector.broadcast %99 : f32 to vector<1x256xf32>
    %595 = arith.mulf %594, %2 : vector<1x256xf32>
    %596 = arith.addf %584, %595 : vector<1x256xf32>
    %597 = vector.broadcast %100 : f32 to vector<1x256xf32>
    %598 = arith.mulf %597, %258 : vector<1x256xf32>
    %599 = arith.addf %587, %598 : vector<1x256xf32>
    %600 = vector.broadcast %101 : f32 to vector<1x256xf32>
    %601 = arith.mulf %600, %262 : vector<1x256xf32>
    %602 = arith.addf %590, %601 : vector<1x256xf32>
    %603 = vector.broadcast %102 : f32 to vector<1x256xf32>
    %604 = arith.mulf %603, %266 : vector<1x256xf32>
    %605 = arith.addf %593, %604 : vector<1x256xf32>
    %606 = arith.addf %602, %605 : vector<1x256xf32>
    %607 = arith.addf %596, %599 : vector<1x256xf32>
    %608 = arith.addf %606, %607 : vector<1x256xf32>
    %c0_119 = arith.constant 0 : index
    %c128_120 = arith.constant 128 : index
    %609 = vector.load %arg7[%c0_119, %c128_120] : memref<1x512xf32, #tpu.memory_space<vmem>>, vector<1x256xf32>
    tpu.vector_store %arg7[%c0_119, %c128_120], %608 {strides = array<i32>} : memref<1x512xf32, #tpu.memory_space<vmem>>, vector<1x256xf32>,
    %c0_121 = arith.constant 0 : index
    %c176 = arith.constant 176 : index
    %610 = vector.load %arg7[%c0_121, %c176] : memref<1x512xf32, #tpu.memory_space<vmem>>, vector<1x256xf32>
    %cst_122 = arith.constant 0.000000e+00 : f32
    %611 = vector.broadcast %cst_122 : f32 to vector<1x256xf32>
    %612 = arith.select %212, %610, %611 : vector<1x256xi1>, vector<1x256xf32>
    %613 = arith.addf %513, %612 : vector<1x256xf32>
    %614 = arith.addf %613, %563 : vector<1x256xf32>
    %615 = arith.negf %614 : vector<1x256xf32>
    %616 = math.exp %615 : vector<1x256xf32>
    %cst_123 = arith.constant 1.000000e+00 : f32
    %617 = vector.broadcast %cst_123 : f32 to vector<1x256xf32>
    %618 = arith.addf %617, %616 : vector<1x256xf32>
    %619 = arith.divf %617, %618 : vector<1x256xf32>
    %c0_124 = arith.constant 0 : index
    %c0_125 = arith.constant 0 : index
    %c0_126 = arith.constant 0 : index
    %620 = vector.load %arg5[%c0_124, %c0_125, %c0_126] : memref<1x1x256xf32, #tpu.memory_space<vmem>>, vector<1x1x256xf32>
    %621 = vector.shape_cast %620 : vector<1x1x256xf32> to vector<1x256xf32>
    %622 = vector.shape_cast %619 : vector<1x256xf32> to vector<1x1x256xf32>
    tpu.vector_store %arg5[%c0_124, %c0_125, %c0_126], %622 {strides = array<i32>} : memref<1x1x256xf32, #tpu.memory_space<vmem>>, vector<1x1x256xf32>,
    return
  }
  func.func @transform_0(%arg0: i32) -> (i32, i32, i32) {
    %c0_i32 = arith.constant 0 : i32
    %c0_i32_0 = arith.constant 0 : i32
    %c0_i32_1 = arith.constant 0 : i32
    return %arg0, %c0_i32, %c0_i32_0 : i32, i32, i32
  }
  func.func @transform_1(%arg0: i32) -> (i32, i32) {
    %c0_i32 = arith.constant 0 : i32
    %c0_i32_0 = arith.constant 0 : i32
    %c0_i32_1 = arith.constant 0 : i32
    return %c0_i32, %c0_i32_0 : i32, i32
  }
  func.func @transform_2(%arg0: i32) -> (i32, i32) {
    %c0_i32 = arith.constant 0 : i32
    %c0_i32_0 = arith.constant 0 : i32
    %c0_i32_1 = arith.constant 0 : i32
    return %c0_i32, %c0_i32_0 : i32, i32
  }
  func.func @transform_3(%arg0: i32) -> i32 {
    %c0_i32 = arith.constant 0 : i32
    %c0_i32_0 = arith.constant 0 : i32
    return %c0_i32 : i32
  }
  func.func @transform_4(%arg0: i32) -> (i32, i32, i32) {
    %c0_i32 = arith.constant 0 : i32
    %c0_i32_0 = arith.constant 0 : i32
    %c0_i32_1 = arith.constant 0 : i32
    return %arg0, %c0_i32, %c0_i32_0 : i32, i32, i32
  }
}

</mosaic_0001>

<bundles_post_ra>
// kernel: tpu_custom_call.1
= control target key start
LH: loop header
LB: loop body
LE: loop exit
PB: predicated region body
PF: predicated region fallthrough
CT: control target
= control target key end

     0   :  { %s2769_s0 = inlined_call_operand.hbm [shape: f32[2,4,256], index: 0, kind: input, shape index: {}]   ;;  %s2770_s1 = inlined_call_operand.hbm [shape: s32[1,256], index: 1, kind: input, shape index: {}]   ;;  %s2771_s2 = inlined_call_operand.hbm [shape: s32[1,256], index: 2, kind: input, shape index: {}]   ;;  %s2772_s3 = inlined_call_operand.vmem [shape: f32[98], index: 3, kind: input, shape index: {}]   ;;  %s2773_s4 = inlined_call_operand.hbm [shape: f32[2,1,256], index: 4, kind: output, shape index: {}]  }
   0x1   :  { %2822 = sst [smem:[#allocation78_spill]] %s2769_s0 }
   0x2   :  { %2823 = sst [smem:[#allocation79_spill]] %s2770_s1 }
   0x3   :  { %2824 = sst [smem:[#allocation80_spill]] %s2771_s2 }
   0x4   :  { %2825 = sst [smem:[#allocation81_spill]] %s2772_s3 }
   0x5   :  { %2826 = sst [smem:[#allocation82_spill]] %s2773_s4 }
   0x6   :  { %9 = vsyncpa [#allocation5], 0 }
   0x7   :  { %11 = vsyncpa [#allocation5 + $0x1], 0 }
   0x8   :  { %12 = vsyncpa [#allocation9], 0 }
   0x9   :  { %13 = vsyncpa [#allocation7], 0 }
   0xa   :  { %14 = vsyncpa [#allocation6], 0 }
   0xb   :  { %16 = vsyncpa [#allocation6 + $0x1], 0  ;;  %s1681_s15 = smov 0   ;;  %s1683_s16 = smov 0  }
   0xc   :  { %s1685_s17 = smov 0   ;;  %s1687_s18 = smov 0  }
   0xd LB: > { %2827 = sst [smem:[#allocation17_spill]] %s1627_s15  ;;  %s1702_s19 = sadd.s32 4294967295, %s1639_s18   ;;  %s1639_s18 = sphi %s1687_s18, %s3023_s18   ;;  %s1635_s17 = sphi %s1685_s17, %s3026_s17   ;;  %s1631_s16 = sphi %s1683_s16, %s3025_s16   ;;  %s1627_s15 = sphi %s1681_s15, %s3024_s15  }
   0xe   : > { %2828 = sst [smem:[#allocation18_spill]] %s1631_s16  ;;  %s1249_s20 = sadd.s32 4294967294, %s1639_s18  }
   0xf   : > { %2829 = sst [smem:[#allocation19_spill]] %s1635_s17  ;;  %p42_p0 = scmp.ne.s32.totalorder %s1631_s16, %s1627_s15 }
  0x10   : > { %2830 = sst [smem:[#allocation20_spill]] %s1639_s18  ;;  %p43_p1 = scmp.eq.s32.totalorder %s1702_s19, 0 }
  0x11   : > { %2831 = sst [smem:[#allocation21_spill]] %s1702_s19  ;;  %p129_p2 = scmp.eq.s32.totalorder %s1702_s19, 1 }
  0x12   : > { %p135_p3 = scmp.eq.s32.totalorder %s1249_s20, 1  ;;  %p1711_p4 = por %p43_p1, %p42_p0 }
  0x13   : > { %p1250_p5 = scmp.ge.s32.totalorder %s1639_s18, 1  ;;  %p142_p7 = scmp.lt.s32.totalorder %s1639_s18, 3 }
  0x14   : > { %p1716_p6 = por %p135_p3, %p42_p0  ;;  %s2835_s1 = sld [smem:[#allocation79_spill]] }
  0x15   : > { %p1724_p8 = pnand %p1250_p5, %p142_p7  ;;  %s1641_s27 = smov [#allocation8]  }
  0x16   : > { %s2833_s22 = scalar_select %p1716_p6, 1, 0 }
  0x17   : > { %p1383_p10 = pneg %p1724_p8  ;;  %s156_s28 = sshll.u32 %s1641_s27, 4  ;;  %s157_s28 = int_to_ptr.vmem [resolvable:$true] %s156_s28 }
  0x18   : > { %2834 = sst [smem:[#allocation22_spill]] %s2833_s22  ;;  %s1642_s9 = smov [#allocation10]  }
  0x19   : > { %s2837_s2 = sld [smem:[#allocation80_spill]]  ;;  %p1384_p11 = pnand %p1383_p10, %p43_p1 }
  0x1a   : > { %s154_s25 = sshll.u32 %s2835_s1, 4  ;;  %s2838_s3 = sld [smem:[#allocation81_spill]]  ;;  %s155_s25 = int_to_ptr.hbm [resolvable:$true] %s154_s25 }
  0x1b   : > { %s168_s10 = sshll.u32 %s1642_s9, 4  ;;  %s1643_s11 = smov [#allocation11]   ;;  %s169_s10 = int_to_ptr.vmem [resolvable:$true] %s168_s10 }
  0x1c   : > { %1386 = dma.hbm_to_vmem [thread:$0]  (!%p1384_p11), %s155_s25, 32, %s157_s28, [#allocation9]  }
  0x1d   : > { %s1740_s12 = sadd.s32 1, %s1639_s18   ;;  %s29_s14 = sadd.s32 1, %s1635_s17 }
  0x1e   : > { %2839 = sst [smem:[#allocation23_spill]] %s1740_s12  ;;  %s26_s13 = ssub.s32 %s1639_s18, %s1740_s12 }
  0x1f   : > { %s166_s5 = sshll.u32 %s2837_s2, 4  ;;  %p27_p12 = scmp.eq.s32.totalorder %s26_s13, 0  ;;  %s167_s5 = int_to_ptr.hbm [resolvable:$true] %s166_s5 }
  0x20   : > { %s178_s8 = sshll.u32 %s2838_s3, 4  ;;  %p36_p13 = scmp.ne.s32.totalorder %s1635_s17, %s1631_s16  ;;  %s179_s8 = int_to_ptr.vmem [resolvable:$true] %s178_s8 }
  0x21   : > { %1389 = dma.hbm_to_vmem [thread:$0]  (!%p1384_p11), %s167_s5, 32, %s169_s10, [#allocation9]  }
  0x22   : > { %1392 = dma.vmem_to_smem (!%p1384_p11), %s179_s8, 16, %s1643_s11, [#allocation7]  }
  0x23   : > { %p37_p0 = scmp.eq.s32.totalorder %s1639_s18, 0  ;;  %p1753_p3 = por %p129_p2, %p36_p13 }
  0x24   : > { %s1749_s20 = scalar_select %p27_p12, %s1635_s17, %s29_s14  }
  0x25   : > { %s2841_s23 = scalar_select %p1753_p3, 1, 0 }
  0x26   : > { %2840 = sst [smem:[#allocation24_spill]] %s1749_s20  ;;  %p1404_p5 = scmp.lt.s32.totalorder %s1639_s18, 2 }
  0x27   : > { %2842 = sst [smem:[#allocation25_spill]] %s2841_s23  ;;  %s189_s24 = sand.u32 1, %s1635_s17  }
  0x28   : > { %s1366_s25 = sshll.u32 %s1639_s18, 3  ;;  %p38_p7 = por %p37_p0, %p36_p13 }
  0x29   : > { %s1255_s27 = sshll.u32 %s189_s24, 3  ;;  %s2843_s0 = sld [smem:[#allocation78_spill]] }
  0x2a   : > { %s193_s6 = scalar_lea.vmem [#allocation4], %s1255_s27  ;;  %p1763_p10 = pnand %p1404_p5, %p38_p7 }
  0x2b   : > { %s202_s7 = sshll.u32 %s193_s6, 4  ;;  %s190_s9 = scalar_lea.sflag [#allocation5], %s189_s24  ;;  %s203_s7 = int_to_ptr.vmem [resolvable:$true] %s202_s7 }
  0x2c   : > { %p1539_p11 = pneg %p1763_p10 }
  0x2f   : > { %s198_s30 = scalar_lea.hbm %s2843_s0, %s1366_s25  ;;  %s1542_s25 = scalar_lea.hbm %s2843_s0, 16 }
  0x30   : > { %s200_s5 = sshll.u32 %s198_s30, 4  ;;  %s201_s5 = int_to_ptr.hbm [resolvable:$true] %s200_s5 }
  0x31   : > { %s1535_s10 = sshra.s32 %s201_s5, 4  ;;  %s1536_s10 = int_to_ptr.hbm [resolvable:$true] %s1535_s10 }
  0x32   : > { %s1537_s11 = scalar_lea.hbm %s1536_s10, 8  ;;  %p1543_p0 = scmp.lt.s32.totalorder %s1536_s10, %s2843_s0 }
  0x33   : > { %p1538_p2 = scmp.ne.s32.totalorder %s1536_s10, %s1537_s11  ;;  %p1544_p5 = scmp.lt.s32.totalorder %s1542_s25, %s1537_s11 }
  0x35   : > { %p1540_p12 = pnand %p1539_p11, %p1538_p2  ;;  %p1545_p7 = por %p1544_p5, %p1543_p0 }
  0x37   : > { %p1541_p13 = pneg %p1540_p12 }
  0x39   : > { %p1546_p9 = pnand %p1545_p7, %p1541_p13 }
  0x3b   : > { %1549 = shalt.err (!%p1546_p9)
}
  0x3c   : > { %1396 = dma.hbm_to_vmem [thread:$0]  (!%p1763_p10), %s201_s5, 128, %s203_s7, %s190_s9  }
  0x3d   : > { %211 = sbr.rel (%p1724_p8) target bundleno = 472 (0x1d8), region = 36 }
  0x42   : > { %s1780_s24 = sand.u32 1, %s1631_s16  }
  0x43   : > { %2845 = sst [smem:[#allocation26_spill]] %s1780_s24  ;;  %s1259_s29 = sshll.u32 %s1780_s24, 3 }
  0x44   : > { %s214_s30 = scalar_lea.sflag [#allocation5], %s1780_s24  ;;  %s217_s6 = scalar_lea.vmem [#allocation4], %s1259_s29 }
  0x45   : > { %1610 = dma.done.wait (%p1711_p4), %s214_s30, 128  }
  0x46   : > { %1612 = vsyncadd (%p1711_p4), %s214_s30, 4294967168 }
  0x47   : > { %1614 = dma.done.wait (%p43_p1), [#allocation9], 64  }
  0x48   : > { %1616 = vsyncadd (%p43_p1), [#allocation9], 4294967232 }
  0x49   : > { %1618 = dma.done.wait (%p43_p1), [#allocation7], 16  }
  0x4a   : > { %1620 = vsyncadd (%p43_p1), [#allocation7], 4294967280 }
  0x4b   : > { %238 = sfence }
  0x4c   : > { %v259_v0 = vld [vmem:[%s217_s6] sm:$0xff]  ;;  %vm266_vm0 = vcmask 1043456   ;;  %v456_v21 = vlaneseq  ;;  %vm453_vm1 = vcmask 1040384   ;;  %s1644_s21 = smov 1   ;;  %s1645_s26 = smov 3   ;;  %vm489_vm3 = vcmask 1039360  }
  0x4d   : > { %261 = vst [vmem:[#allocation1] ss:$2 sm:$0xff] %v259_v0  ;;  %s1646_s5 = smov 127   ;;  %s1647_s7 = smov 2   ;;  %v1894_v46 = vld [vmem:[#allocation8] sm:$0x3] }
  0x4e   : > { %vm1805_vm2 = vcmp.lt.s32.totalorder %v456_v21, 256  ;;  %s1648_s8 = smov 126   ;;  %s1649_s9 = smov 125   ;;  %v426_v47 = vadd.s32 1, %v1894_v46  ;;  %v1910_v50 = vadd.s32 2, %v1894_v46  ;;  %vm496_vm8 = vcmask 1031168  }
  0x4f   : > { %s1822_s10 = sld [smem:[#allocation11 + $0x4]]  ;;  %vm473_vm12 = vcmask 15360   ;;  %vm466_vm15 = vcmask 23552  }
  0x50   : > { %s1824_s11 = sld [smem:[#allocation11 + $0xb]]  ;;  %vm427_vm4 = vcmp.ge.s32.totalorder %v426_v47, 0  ;;  %vm428_vm5 = vcmp.lt.s32.totalorder %v426_v47, 16  ;;  %vm435_vm6 = vcmp.ge.s32.totalorder %v1910_v50, 0  ;;  %vm436_vm7 = vcmp.lt.s32.totalorder %v1910_v50, 16 }
  0x51   : > { %s1826_s13 = sld [smem:[#allocation11 + $0x12]]  ;;  %vm1955_vm9 = vmand %vm427_vm4, %vm428_vm5 }
  0x52   : > { %s1828_s14 = sld [smem:[#allocation11 + $0x19]] }
  0x53   : > { %s1830_s25 = sld [smem:[#allocation11 + $0x20]] }
  0x54   : > { %v262_v1 = vld.sshfl [vmem:[#allocation1] sm:$0xff pattern:$0x75316420]  ;;  %v263_v2 = vld.sshfl [vmem:[#allocation1 + $0x8] sm:$0xff pattern:$0x75316420] }
  0x55   : > { %v267_v3 = vsel %vm266_vm0, %v262_v1, 0.0  ;;  %v274_v4 = vsel %vm266_vm0, %v263_v2, 0.0  ;;  %281 = vst [vmem:[#allocation1] ss:$2 sm:$0xff] %v259_v0  ;;  %s1832_s27 = sld [smem:[#allocation11 + $0x27]]  ;;  %v568_v48 = vstv %s1822_s10  ;;  %v1939_v1 = vadd.s32 4294967295, %v1894_v46 }
  0x56   : > { %v268_v5 = vrot.slane %v267_v3, 4  ;;  %v275_v6 = vrot.slane %v274_v4, 4  ;;  %s1834_s28 = sld [smem:[#allocation11 + $0x2e]]  ;;  %v649_v49 = vstv %s1824_s11 }
  0x57   : > { %s1836_s29 = sld [smem:[#allocation11 + $0x5]]  ;;  %v730_v51 = vstv %s1826_s13  ;;  %vm419_vm4 = vcmp.ge.s32.totalorder %v1939_v1, 0  ;;  %vm420_vm5 = vcmp.lt.s32.totalorder %v1939_v1, 16 }
  0x58   : > { %v269_v7 = vadd.f32 %v268_v5, %v267_v3  ;;  %v276_v8 = vadd.f32 %v275_v6, %v274_v4  ;;  %s1838_s30 = sld [smem:[#allocation11 + $0xc]]  ;;  %v811_v52 = vstv %s1828_s14 }
  0x59   : > { %s1840_s6 = sld [smem:[#allocation11 + $0x13]]  ;;  %v882_v53 = vstv %s1830_s25 }
  0x5a   : > { %v270_v9 = vrot.slane %v269_v7, 2  ;;  %v277_v10 = vrot.slane %v276_v8, 2  ;;  %s1854_s0 = sld [smem:[#allocation11 + $0x10]] }
  0x5b   : > { %s1856_s1 = sld [smem:[#allocation11 + $0x1e]]  ;;  %v963_v54 = vstv %s1832_s27 }
  0x5c   : > { %v271_v11 = vadd.f32 %v270_v9, %v269_v7  ;;  %v278_v12 = vadd.f32 %v277_v10, %v276_v8  ;;  %v282_v13 = vld.sshfl [vmem:[#allocation1] sm:$0xff pattern:$0x75316420]  ;;  %v283_v14 = vld.sshfl [vmem:[#allocation1 + $0x8] sm:$0xff pattern:$0x75316420]  ;;  %v1044_v55 = vstv %s1834_s28 }
  0x5d   : > { %v286_v15 = vsel %vm266_vm0, %v282_v13, -inf  ;;  %v293_v16 = vsel %vm266_vm0, %v283_v14, -inf  ;;  %2848 = sst [smem:[#allocation27_spill]] %s1836_s29  ;;  %v571_v56 = vstv %s1836_s29  ;;  %v1949_v7 = vadd.s32 4294967294, %v1894_v46  ;;  %vm2047_vm0 = vmand %vm435_vm6, %vm436_vm7 }
  0x5e   : > { %v272_v17 = vrot.slane %v271_v11, 1  ;;  %v279_v18 = vrot.slane %v278_v12, 1  ;;  %v287_v19 = vrot.slane %v286_v15, 4  ;;  %v294_v20 = vrot.slane %v293_v16, 4  ;;  %2849 = sst [smem:[#allocation28_spill]] %s1838_s30 }
  0x5f   : > { %2850 = sst [smem:[#allocation29_spill]] %s1840_s6  ;;  %v652_v58 = vstv %s1838_s30  ;;  %v733_v59 = vstv %s1840_s6  ;;  %vm411_vm10 = vcmp.ge.s32.totalorder %v1949_v7, 0  ;;  %vm412_vm11 = vcmp.lt.s32.totalorder %v1949_v7, 16 }
  0x60   : > { %v273_v22 = vadd.f32 %v272_v17, %v271_v11  ;;  %v280_v23 = vadd.f32 %v279_v18, %v278_v12  ;;  %v288_v24 = vmax.f32 %v286_v15, %v287_v19  ;;  %v295_v25 = vmax.f32 %v293_v16, %v294_v20  ;;  %2857 = sst [smem:[#allocation36_spill]] %s1854_s0  ;;  %vm2120_vm7 = vmand %vm411_vm10, %vm412_vm11 }
  0x61   : > { %2858 = sst [smem:[#allocation37_spill]] %s1856_s1  ;;  %v1962_v11 = vadd.s32 4294967293, %v1894_v46  ;;  %vm480_vm6 = vcmask 7168   ;;  %vm2201_vm11 = vmand %vm419_vm4, %vm420_vm5  ;;  %vm630_vm4 = vcmask 392192  }
  0x62   : > { %v1800_v26 = vmul.f32 0.25, %v273_v22  ;;  %v1802_v27 = vmul.f32 0.25, %v280_v23  ;;  %v289_v28 = vrot.slane %v288_v24, 2  ;;  %v296_v29 = vrot.slane %v295_v25, 2  ;;  %s1858_s2 = sld [smem:[#allocation11 + $0x25]] }
  0x63   : > { %s1860_s3 = sld [smem:[#allocation11 + $0x2c]]  ;;  %vm403_vm13 = vcmp.ge.s32.totalorder %v1962_v11, 0  ;;  %vm404_vm14 = vcmp.lt.s32.totalorder %v1962_v11, 16 }
  0x64   : > { %v452_v30 = vrot.slane %v1802_v27, 7  ;;  %v290_v32 = vmax.f32 %v288_v24, %v289_v28  ;;  %v297_v33 = vmax.f32 %v295_v25, %v296_v29  ;;  %s1862_s20 = sld [smem:[#allocation11]]  ;;  %vm2168_vm10 = vmand %vm403_vm13, %vm404_vm14 }
  0x65   : > { %s1864_s17 = sld [smem:[#allocation11 + $0x7]] }
  0x66   : > { %v454_v34 = vsel %vm453_vm1, %v1800_v26, %v452_v30  ;;  %v291_v35 = vrot.slane %v290_v32, 1  ;;  %v298_v36 = vrot.slane %v297_v33, 1  ;;  %s1866_s16 = sld [smem:[#allocation11 + $0xe]] }
  0x67   : > { %460 = vst.msk [vmem:[#allocation2 + $0x1] sm:$0x3] %vm1805_vm2, %v454_v34  ;;  %s1868_s12 = sld [smem:[#allocation11 + $0x15]] }
  0x68   : > { %v1813_v37 = vmax.f32 %v290_v32, %v291_v35  ;;  %v1815_v38 = vmax.f32 %v297_v33, %v298_v36  ;;  %2859 = sst [smem:[#allocation38_spill]] %s1858_s2 }
  0x69   : > { %2860 = sst [smem:[#allocation39_spill]] %s1860_s3 }
  0x6a   : > { %v509_v39 = vrot.slane %v1815_v38, 7  ;;  %2861 = sst [smem:[#allocation40_spill]] %s1862_s20  ;;  %v554_v12 = vstv %s1862_s20 }
  0x6b   : > { %2862 = sst [smem:[#allocation41_spill]] %s1864_s17 }
  0x6c   : > { %v510_v40 = vsel %vm453_vm1, %v1813_v37, %v509_v39  ;;  %2863 = sst [smem:[#allocation42_spill]] %s1866_s16 }
  0x6d   : > { %513 = vst.msk [vmem:[#allocation2 + $0x5] sm:$0x3] %vm1805_vm2, %v510_v40  ;;  %2864 = sst [smem:[#allocation43_spill]] %s1868_s12 }
  0x6e   : > { %v461_v41 = vld [vmem:[#allocation2] sm:$0x7]  ;;  %s1870_s18 = sld [smem:[#allocation11 + $0x1c]] }
  0x6f   : > { %v484_v42 = vld [vmem:[#allocation2 + $0x1] sm:$0x7]  ;;  %477 = vrot.lane.b32.xlu0 %v461_v41, %s1644_s21  ;;  %463 = vrot.lane.b32.xlu1 %v461_v41, %s1645_s26  ;;  %s1872_s22 = sld [smem:[#allocation11 + $0x23]] }
  0x70   : > { %486 = vrot.lane.b32.xlu2 %v484_v42, %s1646_s5  ;;  %s1874_s15 = sld [smem:[#allocation11 + $0x2a]] }
  0x71   : > { %s1876_s23 = sld [smem:[#allocation11 + $0x32]] }
  0x72   : > { %s1878_s4 = sld [smem:[#allocation11 + $0x39]] }
  0x73   : > { %s1880_s19 = sld [smem:[#allocation11 + $0x40]] }
  0x74   : > { %v514_v43 = vld [vmem:[#allocation2 + $0x4] sm:$0x7]  ;;  %2865 = sst [smem:[#allocation44_spill]] %s1870_s18 }
  0x75   : > { %v534_v44 = vld [vmem:[#allocation2 + $0x5] sm:$0x7]  ;;  %2866 = sst [smem:[#allocation45_spill]] %s1872_s22 }
  0x76   : > { %2867 = sst [smem:[#allocation46_spill]] %s1874_s15 }
  0x77   : > { %516 = vrot.lane.b32.xlu0 %v514_v43, %s1645_s26  ;;  %470 = vrot.lane.b32.xlu1 %v461_v41, %s1647_s7  ;;  %s1844_s26 = sld [smem:[#allocation11 + $0x21]] }
  0x78   : > { %493 = vrot.lane.b32.xlu2 %v484_v42, %s1648_s8  ;;  %2868 = sst [smem:[#allocation47_spill]] %s1876_s23 }
  0x79   : > { %2869 = sst [smem:[#allocation48_spill]] %s1878_s4 }
  0x7a   : > { %2870 = sst [smem:[#allocation49_spill]] %s1880_s19 }
  0x7b   : > { %s1882_s24 = sld [smem:[#allocation11 + $0x4e]] }
  0x7c   : > { %s1884_s17 = sld [smem:[#allocation11 + $0x55]] }
  0x7d   : > { %2852 = sst [smem:[#allocation31_spill]] %s1844_s26  ;;  %v885_v61 = vstv %s1844_s26 }
  0x7e   : > { %s1886_s16 = sld [smem:[#allocation11 + $0x5c]] }
  0x7f   : > { %536 = vrot.lane.b32.xlu0 %v534_v44, %s1646_s5  ;;  %500 = vrot.lane.b32.xlu1 %v484_v42, %s1649_s9  ;;  %s1846_s5 = sld [smem:[#allocation11 + $0x28]] }
  0x80   : > { %522 = vrot.lane.b32.xlu2 %v514_v43, %s1647_s7  ;;  %s1848_s7 = sld [smem:[#allocation11 + $0x2f]] }
  0x81   : > { %2871 = sst [smem:[#allocation50_spill]] %s1882_s24 }
  0x82   : > { %2872 = sst [smem:[#allocation51_spill]] %s1884_s17 }
  0x83   : > { %s1888_s12 = sld [smem:[#allocation11 + $0x3]] }
  0x84   : > { %2873 = sst [smem:[#allocation52_spill]] %s1886_s16 }
  0x85   : > { %2853 = sst [smem:[#allocation32_spill]] %s1846_s5  ;;  %v966_v62 = vstv %s1846_s5 }
  0x86   : > { %2854 = sst [smem:[#allocation33_spill]] %s1848_s7  ;;  %v1047_v0 = vstv %s1848_s7 }
  0x87   : > { %528 = vrot.lane.b32.xlu0 %v514_v43, %s1644_s21  ;;  %542 = vrot.lane.b32.xlu1 %v534_v44, %s1648_s8  ;;  %s1842_s21 = sld [smem:[#allocation11 + $0x1a]] }
  0x88   : > { %548 = vrot.lane.b32.xlu2 %v534_v44, %s1649_s9  ;;  %s1850_s8 = sld [smem:[#allocation11 + $0x2]] }
  0x89   : > { %s1852_s9 = sld [smem:[#allocation11 + $0x9]]  ;;  %v563_v19 = vstv %s1888_s12 }
  0x8a   : > { %s1890_s22 = sld [smem:[#allocation11 + $0xa]]  ;;  %v1997_v33 = vmul.f32 %v563_v19, %v1800_v26  ;;  %v2000_v34 = vmul.f32 %v563_v19, %v1802_v27 }
  0x8b   : > { %s1892_s23 = sld [smem:[#allocation11 + $0x11]] }
  0x8c   : > { %s1896_s19 = sld [smem:[#allocation11 + $0x1f]] }
  0x8d   : > { %2851 = sst [smem:[#allocation30_spill]] %s1842_s21  ;;  %v814_v60 = vstv %s1842_s21 }
  0x8e   : > { %2855 = sst [smem:[#allocation34_spill]] %s1850_s8 }
  0x8f   : > { %2856 = sst [smem:[#allocation35_spill]] %s1852_s9 }
  0x90   : > { %s1898_s24 = sld [smem:[#allocation11 + $0x26]]  ;;  %v644_v20 = vstv %s1890_s22 }
  0x91   : > { %s1900_s17 = sld [smem:[#allocation11 + $0x2d]]  ;;  %v2004_v36 = vmul.f32 %v644_v20, %v1800_v26 }
  0x92   : > { %s1903_s16 = sld [smem:[#allocation11 + $0x31]] }
  0x93   : > { %s1905_s4 = sld [smem:[#allocation11 + $0x38]] }
  0x94   : > { %s1935_s29 = sld [smem:[#allocation11 + $0x5b]] }
  0x95   : > { %s2882_s6 = sld [smem:[#allocation41_spill]] }
  0x96   : > { %2874 = sst [smem:[#allocation53_spill]] %s1898_s24 }
  0x97   : > { %2875 = sst [smem:[#allocation54_spill]] %s1900_s17 }
  0x98   : > { %2876 = sst [smem:[#allocation55_spill]] %s1903_s16 }
  0x99   : > { %2877 = sst [smem:[#allocation56_spill]] %s1905_s4 }
  0x9a   : > { %s1912_s24 = sld [smem:[#allocation11 + $0x3f]] }
  0x9b   : > { %s1918_s17 = sld [smem:[#allocation11 + $0x46]]  ;;  %v635_v13 = vstv %s2882_s6 }
  0x9c   : > { %s1922_s4 = sld [smem:[#allocation11 + $0x4d]] }
  0x9d   : > { %s2883_s21 = sld [smem:[#allocation42_spill]] }
  0x9e   : > { %s1951_s7 = sld [smem:[#allocation11 + $0x8]] }
  0x9f   : > { %s2890_s2 = sld [smem:[#allocation47_spill]] }
  0xa0   : > { %2878 = sst [smem:[#allocation57_spill]] %s1912_s24 }
  0xa1   : > { %2879 = sst [smem:[#allocation58_spill]] %s1918_s17 }
  0xa2   : > { %2880 = sst [smem:[#allocation59_spill]] %s1922_s4 }
  0xa3   : > { %s1927_s24 = sld [smem:[#allocation11 + $0x54]]  ;;  %v716_v14 = vstv %s2883_s21 }
  0xa4   : > { %2887 = sst [smem:[#allocation62_spill]] %s1951_s7 }
  0xa5   : > { %s1965_s1 = sld [smem:[#allocation11 + $0xf]]  ;;  %v586_v22 = vstv %s2890_s2 }
  0xa6   : > { %s2891_s0 = sld [smem:[#allocation48_spill]] }
  0xa7   : > { %s2892_s9 = sld [smem:[#allocation49_spill]] }
  0xa8   : > { %s2893_s8 = sld [smem:[#allocation50_spill]] }
  0xa9   : > { %2881 = sst [smem:[#allocation60_spill]] %s1927_s24 }
  0xaa   : > { %s1943_s24 = sld [smem:[#allocation11 + $0x1]] }
  0xab   : > { %s1971_s5 = sld [smem:[#allocation11 + $0x16]] }
  0xac   : > { %s2894_s7 = sld [smem:[#allocation51_spill]]  ;;  %v667_v23 = vstv %s2891_s0 }
  0xad   : > { %s1977_s3 = sld [smem:[#allocation11 + $0x1d]]  ;;  %v748_v24 = vstv %s2892_s9 }
  0xae   : > { %s1986_s12 = sld [smem:[#allocation11 + $0x24]]  ;;  %v900_v28 = vstv %s2893_s8 }
  0xaf   : > { %s1992_s22 = sld [smem:[#allocation11 + $0x2b]] }
  0xb0   : > { %2885 = sst [smem:[#allocation61_spill]] %s1943_s24 }
  0xb1   : > { %s2895_s24 = sld [smem:[#allocation52_spill]] }
  0xb2   : > { %v981_v29 = vstv %s2894_s7  ;;  %s2006_s15 = sld [smem:[#allocation11 + $0x35]] }
  0xb3   : > { %s2896_s30 = sld [smem:[#allocation53_spill]] }
  0xb4   : > { %s2024_s16 = sld [smem:[#allocation11 + $0x3c]] }
  0xb5   : > { %s2900_s11 = sld [smem:[#allocation54_spill]] }
  0xb6   : > { %s2041_s13 = sld [smem:[#allocation11 + $0x43]] }
  0xb7   : > { %v1062_v30 = vstv %s2895_s24  ;;  %s2064_s14 = sld [smem:[#allocation11 + $0x4a]] }
  0xb8   : > { %s2903_s25 = sld [smem:[#allocation60_spill]]  ;;  %v2966_v6 = vstv %s2006_s15 }
  0xb9   : > { %s2904_s27 = sld [smem:[#allocation61_spill]] }
  0xba   : > { %s2905_s28 = sld [smem:[#allocation62_spill]] }
  0xbb   : > { %v1039_v19 = vstv %s2900_s11  ;;  %s2088_s4 = sld [smem:[#allocation11 + $0x58]] }
  0xbc   : > { %v2098_v18 = vmul.f32 %v1039_v19, %v1802_v27  ;;  %s2100_s21 = sld [smem:[#allocation11 + $0x5f]] }
  0xbd   : > { %s2106_s20 = sld [smem:[#allocation11 + $0x3b]] }
  0xbe   : > { %2914 = vst [vmem:[#allocation67_spill] sm:$0xff] %v2098_v18  ;;  %s2143_s11 = sld [smem:[#allocation11 + $0xd]] }
  0xbf   : > { %s2151_s17 = sld [smem:[#allocation11 + $0x42]] }
  0xc0   : > { %s2161_s18 = sld [smem:[#allocation11 + $0x14]] }
  0xc1   : > { %s2175_s6 = sld [smem:[#allocation11 + $0x22]] }
  0xc2   : > { %s2929_s2 = sld [smem:[#allocation44_spill]] }
  0xc3   : > { %s2932_s7 = sld [smem:[#allocation34_spill]] }
  0xc4   : > { %s2933_s24 = sld [smem:[#allocation35_spill]] }
  0xc5   : > { %s2934_s8 = sld [smem:[#allocation36_spill]] }
  0xc6   : > { %s2936_s9 = sld [smem:[#allocation37_spill]] }
  0xc7   : > { %s2940_s26 = sld [smem:[#allocation43_spill]] }
  0xc8   : > { %s2942_s10 = sld [smem:[#allocation46_spill]] }
  0xc9   : > { %s2943_s0 = sld [smem:[#allocation56_spill]] }
  0xca   : > { %v487_v45 = vpop.permute.xlu2 %486  ;;  %s2364_s15 = sld [smem:[#allocation11 + $0x33]] }
  0xcb   : > { %v488_v57 = vrot.slane %v487_v45, 1 }
  0xcd   : > { %v490_v9 = vsel %vm489_vm3, %v487_v45, %v488_v57 }
  0xce   : > { %v492_v21 = vsel %vm1955_vm9, %v490_v9, 0.0 }
  0xcf   : > { %v2010_v39 = vmul.f32 %v568_v48, %v492_v21  ;;  %v2014_v40 = vmul.f32 %v649_v49, %v492_v21  ;;  %v2018_v41 = vmul.f32 %v730_v51, %v492_v21  ;;  %v2022_v42 = vmul.f32 %v811_v52, %v492_v21 }
  0xd0   : > { %v2028_v43 = vmul.f32 %v882_v53, %v492_v21  ;;  %v2032_v44 = vmul.f32 %v963_v54, %v492_v21  ;;  %v2036_v45 = vmul.f32 %v1044_v55, %v492_v21  ;;  %v725_v48 = vstv %s1892_s23  ;;  %s2058_s23 = sld [smem:[#allocation11 + $0x34]] }
  0xd1   : > { %v2054_v52 = vmul.f32 %v644_v20, %v1802_v27  ;;  %v877_v53 = vstv %s1896_s19  ;;  %v958_v54 = vstv %s2896_s30  ;;  %v2067_v21 = vmul.f32 %v725_v48, %v1800_v26  ;;  %s2073_s19 = sld [smem:[#allocation11 + $0x51]] }
  0xd2   : > { %v1933_v63 = vpop.permute.xlu2 %493  ;;  %2899 = vst [vmem:[#allocation63_spill] sm:$0xff] %v2036_v45  ;;  %v2083_v20 = vmul.f32 %v877_v53, %v1802_v27  ;;  %v2086_v9 = vmul.f32 %v958_v54, %v1800_v26  ;;  %v2095_v55 = vmul.f32 %v1039_v19, %v1800_v26  ;;  %s2125_s30 = sld [smem:[#allocation11 + $0x6]] }
  0xd3   : > { %v495_v25 = vrot.slane %v1933_v63, 1 }
  0xd4   : > { %2908 = vst [vmem:[#allocation64_spill] sm:$0xff] %v2086_v9 }
  0xd5   : > { %v497_v51 = vsel %vm496_vm8, %v1933_v63, %v495_v25  ;;  %v2070_v63 = vmul.f32 %v725_v48, %v1802_v27  ;;  %v2080_v48 = vmul.f32 %v877_v53, %v1800_v26  ;;  %2912 = vst [vmem:[#allocation66_spill] sm:$0xff] %v2095_v55 }
  0xd6   : > { %v499_v25 = vsel %vm2047_vm0, %v497_v51, 0.0  ;;  %v2091_v51 = vmul.f32 %v958_v54, %v1802_v27 }
  0xd7   : > { %v2110_v57 = vmul.f32 %v571_v56, %v499_v25  ;;  %v2114_v35 = vmul.f32 %v652_v58, %v499_v25  ;;  %v2129_v56 = vmul.f32 %v733_v59, %v499_v25  ;;  %v2133_v58 = vmul.f32 %v814_v60, %v499_v25 }
  0xd8   : > { %2909 = vst [vmem:[#allocation65_spill] sm:$0xff] %v2091_v51  ;;  %v2137_v15 = vmul.f32 %v885_v61, %v499_v25  ;;  %v2141_v7 = vmul.f32 %v966_v62, %v499_v25  ;;  %v592_v60 = vstv %s2058_s23  ;;  %v673_v59 = vstv %s2106_s20  ;;  %s2931_s20 = sld [smem:[#allocation45_spill]] }
  0xd9   : > { %v594_v11 = vmul.f32 %v592_v60, %v1815_v38  ;;  %v675_v17 = vmul.f32 %v673_v59, %v1815_v38  ;;  %s2938_s23 = sld [smem:[#allocation55_spill]] }
  0xda   : > { %v523_v47 = vpop.permute.xlu2 %522  ;;  %2919 = vst [vmem:[#allocation68_spill] sm:$0xff] %v2141_v7 }
  0xdb   : > { %v524_v50 = vrot.slane %v523_v47, 1  ;;  %v597_v62 = vrot.slane %v594_v11, 7  ;;  %v678_v45 = vrot.slane %v675_v17, 7 }
  0xdd   : > { %v525_v54 = vsel %vm473_vm12, %v523_v47, %v524_v50  ;;  %v2147_v47 = vmul.f32 %v1047_v0, %v499_v25  ;;  %v2944_v25 = vstv %s2933_s24  ;;  %s2323_s24 = sld [smem:[#allocation11 + $0x50]] }
  0xde   : > { %v2156_v61 = vsel %vm2120_vm7, %v525_v54, 0.0 }
  0xdf   : > { %2920 = vst [vmem:[#allocation69_spill] sm:$0xff] %v2147_v47  ;;  %v587_v3 = vmul.f32 %v586_v22, %v2156_v61  ;;  %v668_v50 = vmul.f32 %v667_v23, %v2156_v61  ;;  %v749_v4 = vmul.f32 %v748_v24, %v2156_v61  ;;  %v901_v23 = vmul.f32 %v900_v28, %v2156_v61 }
  0xe0   : > { %2921 = vst [vmem:[#allocation70_spill] sm:$0xff] %v2156_v61  ;;  %v982_v24 = vmul.f32 %v981_v29, %v2156_v61  ;;  %v754_v29 = vstv %s2151_s17  ;;  %s2939_s17 = sld [smem:[#allocation38_spill]] }
  0xe1   : > { %v1994_v32 = vpop.permute.xlu0 %477  ;;  %v464_v10 = vpop.permute.xlu1 %463 }
  0xe2   : > { %v465_v19 = vrot.slane %v464_v10, 1  ;;  %v479_v0 = vrot.slane %v1994_v32, 1 }
  0xe4   : > { %v467_v54 = vsel %vm466_vm15, %v464_v10, %v465_v19  ;;  %v2186_v19 = vadd.s32 3, %v1894_v46  ;;  %v481_v46 = vsel %vm480_vm6, %v1994_v32, %v479_v0  ;;  %v593_v10 = vmul.f32 %v592_v60, %v1813_v37 }
  0xe5   : > { %v469_v5 = vsel %vm2168_vm10, %v467_v54, 0.0  ;;  %v2216_v54 = vmul.f32 %v1062_v30, %v2156_v61  ;;  %v2228_v16 = vsel %vm2201_vm11, %v481_v46, 0.0  ;;  %v674_v60 = vmul.f32 %v673_v59, %v1813_v37 }
  0xe6   : > { %v555_v0 = vmul.f32 %v554_v12, %v469_v5  ;;  %v636_v30 = vmul.f32 %v635_v13, %v469_v5  ;;  %v717_v12 = vmul.f32 %v716_v14, %v469_v5  ;;  %v2935_v32 = vstv %s2929_s2  ;;  %s2947_s2 = sld [smem:[#allocation57_spill]] }
  0xe7   : > { %2930 = vst [vmem:[#allocation71_spill] sm:$0xff] %v2216_v54  ;;  %v2239_v54 = vmul.f32 %v754_v29, %v1813_v37  ;;  %v2937_v46 = vstv %s2931_s20  ;;  %v2247_v59 = vsel %vm453_vm1, %v593_v10, %v597_v62  ;;  %v2250_v14 = vmul.f32 %v754_v29, %v1815_v38  ;;  %s2948_s20 = sld [smem:[#allocation58_spill]] }
  0xe8   : > { %v950_v47 = vmul.f32 %v2937_v46, %v469_v5  ;;  %v570_v55 = vadd.f32 %v2010_v39, %v555_v0  ;;  %v2945_v62 = vstv %s2934_s8  ;;  %v651_v29 = vadd.f32 %v2014_v40, %v636_v30  ;;  %s2523_s8 = sld [smem:[#allocation11 + $0x49]] }
  0xe9   : > { %v517_v53 = vpop.permute.xlu0 %516  ;;  %v2266_v10 = vmul.f32 %v2945_v62, %v2228_v16  ;;  %v732_v39 = vadd.f32 %v2018_v41, %v717_v12  ;;  %v2951_v0 = vstv %s2938_s23  ;;  %v2952_v7 = vstv %s2939_s17  ;;  %s2534_s23 = sld [smem:[#allocation11 + $0x4c]] }
  0xea   : > { %v518_v2 = vrot.slane %v517_v53, 1  ;;  %v2281_v51 = vmul.f32 %v2952_v7, %v2228_v16  ;;  %v2954_v62 = vstv %s2940_s26  ;;  %v965_v40 = vadd.f32 %v2032_v44, %v950_v47  ;;  %s2564_s17 = sld [smem:[#allocation11 + $0x52]] }
  0xeb   : > { %2946 = vst [vmem:[#allocation72_spill] sm:$0xff] %v2266_v10  ;;  %v2285_v10 = vmul.f32 %v2954_v62, %v469_v5  ;;  %v2955_v30 = vstv %s2942_s10  ;;  %v2958_v41 = vstv %s2943_s0  ;;  %v2300_v7 = vadd.f32 %v668_v50, %v651_v29  ;;  %s2574_s26 = sld [smem:[#allocation11 + $0x56]] }
  0xec   : > { %v519_v28 = vsel %vm466_vm15, %v517_v53, %v518_v2  ;;  %v869_v2 = vmul.f32 %v2935_v32, %v469_v5  ;;  %v471_v53 = vpop.permute.xlu1 %470  ;;  %v2941_v32 = vstv %s2932_s7  ;;  %2953 = vst [vmem:[#allocation74_spill] sm:$0xff] %v2281_v51  ;;  %s2956_s7 = sld [smem:[#allocation59_spill]]  ;;  %v2290_v61 = vmul.f32 %v2955_v30, %v469_v5 }
  0xed   : > { %v521_v13 = vsel %vm2168_vm10, %v519_v28, 0.0  ;;  %v2255_v11 = vmul.f32 %v2941_v32, %v2228_v16  ;;  %v2261_v28 = vmul.f32 %v2944_v25, %v2228_v16  ;;  %v472_v18 = vrot.slane %v471_v53, 1  ;;  %s2578_s10 = sld [smem:[#allocation11 + $0x57]] }
  0xee   : > { %v2949_v32 = vstv %s2936_s9  ;;  %v884_v17 = vadd.f32 %v2028_v43, %v869_v2  ;;  %v578_v25 = vmul.f32 %v2951_v0, %v521_v13  ;;  %2957 = vst [vmem:[#allocation75_spill] sm:$0xff] %v2290_v61  ;;  %v659_v12 = vmul.f32 %v2958_v41, %v521_v13  ;;  %s2530_s9 = sld [smem:[#allocation11 + $0x4b]] }
  0xef   : > { %v2272_v9 = vmul.f32 %v2949_v32, %v2228_v16  ;;  %v2292_v32 = vadd.f32 %v587_v3, %v570_v55  ;;  %v2298_v2 = vsel %vm453_vm1, %v674_v60, %v678_v45  ;;  %v2959_v0 = vstv %s2947_s2  ;;  %s2596_s0 = sld [smem:[#allocation11 + $0x29]] }
  0xf0   : > { %v740_v62 = vmul.f32 %v2959_v0, %v521_v13  ;;  %v2960_v51 = vstv %s2948_s20  ;;  %v474_v5 = vsel %vm473_vm12, %v471_v53, %v472_v18  ;;  %vm443_vm13 = vcmp.ge.s32.totalorder %v2186_v19, 0  ;;  %s2599_s2 = sld [smem:[#allocation11 + $0x5a]]  ;;  %s1650_s20 = smov 48  }
  0xf1   : > { %v537_v1 = vpop.permute.xlu0 %536  ;;  %2950 = vst [vmem:[#allocation73_spill] sm:$0xff] %v2272_v9  ;;  %v2306_v9 = vmul.f32 %v2960_v51, %v521_v13  ;;  %vm444_vm14 = vcmp.lt.s32.totalorder %v2186_v19, 16  ;;  %vm503_vm15 = vcmask 1022976   ;;  %v2311_v3 = vadd.f32 %v749_v4, %v732_v39 }
  0xf2   : > { %v538_v46 = vrot.slane %v537_v1, 1  ;;  %v2313_v44 = vadd.f32 %v901_v23, %v884_v17  ;;  %v580_v45 = vperm.slane %v578_v25, 0  ;;  %v2962_v55 = vstv %s2956_s7  ;;  %s2619_s7 = sld [smem:[#allocation11 + $0x5d]] }
  0xf3   : > { %v892_v47 = vmul.f32 %v2962_v55, %v521_v13  ;;  %v2317_v50 = vadd.f32 %v982_v24, %v965_v40  ;;  %v581_v51 = vperm.slane %v578_v25, 1  ;;  %v661_v4 = vperm.slane %v659_v12, 0 }
  0xf4   : > { %v539_v43 = vsel %vm489_vm3, %v537_v1, %v538_v46  ;;  %2961 = vst [vmem:[#allocation76_spill] sm:$0xff] %v2313_v44  ;;  %v759_v1 = vrot.slane %v2250_v14, 7  ;;  %v662_v23 = vperm.slane %v659_v12, 1  ;;  %v2964_v60 = vstv %s2903_s25  ;;  %v501_v14 = vpop.permute.xlu1 %500  ;;  %vm2411_vm3 = vmand %vm443_vm13, %vm444_vm14  ;;  %s2480_s25 = sld [smem:[#allocation11 + $0x17]] }
  0xf5   : > { %2963 = vst [vmem:[#allocation77_spill] sm:$0xff] %v2317_v50  ;;  %v2321_v18 = vsel %vm1955_vm9, %v539_v43, 0.0  ;;  %v2328_v53 = vmul.f32 %v2964_v60, %v521_v13  ;;  %v2332_v24 = vsel %vm2120_vm7, %v474_v5, 0.0  ;;  %v742_v8 = vperm.slane %v740_v62, 0 }
  0xf6   : > { %v743_v46 = vperm.slane %v740_v62, 1  ;;  %v2965_v39 = vstv %s1935_s29  ;;  %v2340_v25 = vadd.f32 %v580_v45, %v1997_v33  ;;  %v894_v30 = vperm.slane %v892_v47, 0  ;;  %s2437_s29 = sld [smem:[#allocation11 + $0x36]] }
  0xf7   : > { %v2337_v17 = vmul.f32 %v2965_v39, %v521_v13  ;;  %v2346_v41 = vmul.f32 %v2966_v6, %v2321_v18  ;;  %v585_v12 = vadd.f32 %v581_v51, %v2000_v34  ;;  %v895_v43 = vperm.slane %v892_v47, 1 }
  0xf8   : > { %v2967_v13 = vstv %s2904_s27  ;;  %v2968_v62 = vstv %s2024_s16  ;;  %v2358_v33 = vadd.f32 %v661_v4, %v2004_v36  ;;  %v666_v45 = vadd.f32 %v662_v23, %v2054_v52  ;;  %s2378_s16 = sld [smem:[#allocation11 + $0x3a]] }
  0xf9   : > { %v558_v0 = vmul.f32 %v2967_v13, %v2332_v24  ;;  %v2355_v5 = vmul.f32 %v2968_v62, %v2321_v18  ;;  %v2969_v55 = vstv %s2905_s28  ;;  %v502_v39 = vrot.slane %v501_v14, 1  ;;  %s2499_s27 = sld [smem:[#allocation11 + $0x1b]] }
  0xfa   : > { %v639_v60 = vmul.f32 %v2969_v55, %v2332_v24  ;;  %v2367_v34 = vadd.f32 %v742_v8, %v2067_v21  ;;  %v747_v47 = vadd.f32 %v743_v46, %v2070_v63  ;;  %v2970_v51 = vstv %s1965_s1  ;;  %v549_v63 = vpop.permute.xlu2 %548  ;;  %s2416_s1 = sld [smem:[#allocation11 + $0x37]] }
  0xfb   : > { %v720_v36 = vmul.f32 %v2970_v51, %v2332_v24  ;;  %v2971_v4 = vstv %s2041_s13  ;;  %v2381_v23 = vadd.f32 %v894_v30, %v2080_v48  ;;  %v2972_v21 = vstv %s1977_s3  ;;  %s2426_s3 = sld [smem:[#allocation11 + $0x3e]] }
  0xfc   : > { %v2376_v52 = vmul.f32 %v2971_v4, %v2321_v18  ;;  %v872_v8 = vmul.f32 %v2972_v21, %v2332_v24  ;;  %v605_v13 = vperm.slane %v2346_v41, 1  ;;  %v2389_v46 = vadd.f32 %v895_v43, %v2083_v20  ;;  %s2465_s13 = sld [smem:[#allocation11 + $0x18]] }
  0xfd   : > { %v573_v62 = vadd.f32 %v2110_v57, %v558_v0  ;;  %v686_v55 = vperm.slane %v2355_v5, 1  ;;  %v906_v51 = vstv %s2323_s24  ;;  %v2395_v4 = vadd.f32 %v2114_v35, %v639_v60  ;;  %v529_v60 = vpop.permute.xlu0 %528  ;;  %s2503_s28 = sld [smem:[#allocation11 + $0x44]] }
  0xfe   : > { %v2973_v48 = vstv %s1971_s5  ;;  %v2974_v21 = vstv %s1986_s12  ;;  %v504_v35 = vsel %vm503_vm15, %v501_v14, %v502_v39  ;;  %v2419_v20 = vadd.f32 %v2129_v56, %v720_v36  ;;  %s2453_s5 = sld [smem:[#allocation11 + $0x3d]] }
  0xff   : > { %v2400_v30 = vmul.f32 %v2973_v48, %v2332_v24  ;;  %v2405_v6 = vmul.f32 %v2974_v21, %v2332_v24  ;;  %v767_v43 = vperm.slane %v2376_v52, 1  ;;  %v2424_v0 = vsel %vm453_vm1, %v2239_v54, %v759_v1  ;;  %s2458_s12 = sld [smem:[#allocation11 + $0x41]] }
 0x100   : > { %v550_v19 = vrot.slane %v549_v63, 1  ;;  %v2429_v48 = vadd.f32 %v2137_v15, %v872_v8  ;;  %v609_v21 = vadd.f32 %v605_v13, %v585_v12  ;;  %v2432_v14 = vmul.f32 %v906_v51, %v1813_v37  ;;  %v543_v8 = vpop.permute.xlu1 %542  ;;  %s2624_s24 = sld [smem:[#allocation11 + $0x5e]] }
 0x101   : > { %v2435_v56 = vmul.f32 %v906_v51, %v1815_v38  ;;  %v690_v54 = vadd.f32 %v686_v55, %v666_v45  ;;  %v2977_v1 = vstv %s2064_s14  ;;  %v2978_v36 = vstv %s2073_s19  ;;  %s2470_s14 = sld [smem:[#allocation11 + $0x45]] }
 0x102   : > { %v2442_v39 = vmul.f32 %v2977_v1, %v2321_v18  ;;  %v2447_v15 = vmul.f32 %v2978_v36, %v2321_v18  ;;  %v2451_v12 = vsel %vm2411_vm3, %v504_v35, 0.0  ;;  %v604_v13 = vperm.slane %v2346_v41, 0  ;;  %s2491_s19 = sld [smem:[#allocation11 + $0x4f]] }
 0x103   : > { %v685_v45 = vperm.slane %v2355_v5, 0  ;;  %v530_v51 = vrot.slane %v529_v60, 1  ;;  %v2460_v1 = vadd.f32 %v767_v43, %v747_v47  ;;  %v551_v36 = vsel %vm503_vm15, %v549_v63, %v550_v19 }
 0x104   : > { %v589_v35 = vstv %s2364_s15  ;;  %v670_v40 = vstv %s2378_s16  ;;  %v619_v29 = vrot.slane %v609_v21, 7  ;;  %v2979_v41 = vstv %s2125_s30  ;;  %s2513_s30 = sld [smem:[#allocation11 + $0x47]]  ;;  %s1651_s15 = smov 32  }
 0x105   : > { %v575_v50 = vmul.f32 %v2979_v41, %v2451_v12  ;;  %v531_v5 = vsel %vm480_vm6, %v529_v60, %v530_v51  ;;  %v544_v55 = vrot.slane %v543_v8, 1  ;;  %v700_v61 = vrot.slane %v690_v54, 7  ;;  %s2658_s16 = sld [smem:[#allocation11 + $0x60]] }
 0x106   : > { %v2980_v44 = vstv %s2143_s11  ;;  %v2478_v63 = vsel %vm2201_vm11, %v531_v5, 0.0  ;;  %v2484_v43 = vadd.f32 %v2022_v42, %v2285_v10  ;;  %v613_v19 = vstv %s2416_s1  ;;  %s2519_s11 = sld [smem:[#allocation11 + $0x48]]  ;;  %s1652_s1 = smov 16  }
 0x107   : > { %v656_v47 = vmul.f32 %v2980_v44, %v2451_v12  ;;  %v2489_v60 = vsel %vm2411_vm3, %v551_v36, 0.0  ;;  %v590_v44 = vmul.f32 %v589_v35, %v2478_v63  ;;  %v671_v22 = vmul.f32 %v670_v40, %v2478_v63 }
 0x108   : > { %v608_v21 = vadd.f32 %v604_v13, %v2340_v25  ;;  %v689_v54 = vadd.f32 %v685_v45, %v2358_v33  ;;  %v919_v51 = vperm.slane %v2447_v15, 1  ;;  %v545_v42 = vsel %vm496_vm8, %v543_v8, %v544_v55 }
 0x109   : > { %v576_v10 = vadd.f32 %v575_v50, %v2255_v11  ;;  %v694_v57 = vstv %s2426_s3  ;;  %v591_v36 = vadd.f32 %v590_v44, %v573_v62  ;;  %v610_v35 = vstv %s2437_s29  ;;  %s1653_s3 = smov 112   ;;  %s1654_s29 = smov 96  }
 0x10a   : > { %v657_v40 = vadd.f32 %v656_v47, %v2261_v28  ;;  %v614_v25 = vmul.f32 %v613_v19, %v2489_v60  ;;  %v691_v33 = vstv %s2453_s5  ;;  %v2511_v8 = vsel %vm2047_vm0, %v545_v42, 0.0  ;;  %s1655_s5 = smov 80  }
 0x10b   : > { %v781_v11 = vrot.slane %v2460_v1, 7  ;;  %v620_v50 = vsel %vm453_vm1, %v608_v21, %v619_v29  ;;  %v701_v62 = vsel %vm453_vm1, %v689_v54, %v700_v61  ;;  %v672_v13 = vadd.f32 %v671_v22, %v2395_v4 }
 0x10c   : > { %v751_v28 = vstv %s2458_s12  ;;  %v615_v45 = vadd.f32 %v614_v25, %v591_v36  ;;  %v611_v55 = vmul.f32 %v610_v35, %v2511_v8  ;;  %v806_v49 = vstv %s2465_s13  ;;  %s3015_s12 = sld [smem:[#allocation26_spill]] }
 0x10d   : > { %v600_v41 = vadd.f32 %v2247_v59, %v576_v10  ;;  %v775_v5 = vstv %s2470_s14  ;;  %v695_v29 = vmul.f32 %v694_v57, %v2489_v60  ;;  %v692_v61 = vmul.f32 %v691_v33, %v2511_v8  ;;  %s3016_s13 = sld [smem:[#allocation21_spill]] }
 0x10e   : > { %v681_v4 = vadd.f32 %v2298_v2, %v657_v40  ;;  %v612_v47 = vadd.f32 %v611_v55, %v2292_v32  ;;  %v803_v19 = vstv %s2480_s25  ;;  %v816_v59 = vadd.f32 %v2133_v58, %v2400_v30 }
 0x10f   : > { %v696_v44 = vadd.f32 %v695_v29, %v672_v13  ;;  %v752_v22 = vmul.f32 %v751_v28, %v2478_v63  ;;  %v807_v21 = vmul.f32 %v806_v49, %v1800_v26  ;;  %v808_v54 = vmul.f32 %v806_v49, %v1802_v27 }
 0x110   : > { %v622_v42 = vadd.f32 %v620_v50, %v600_v41  ;;  %v2981_v10 = vstv %s2161_s18  ;;  %v616_v57 = vadd.f32 %v615_v45, %v612_v47  ;;  %v817_v32 = vstv %s2499_s27  ;;  %s2557_s18 = sld [smem:[#allocation11 + $0x53]] }
 0x111   : > { %v737_v2 = vmul.f32 %v2981_v10, %v2451_v12  ;;  %v703_v36 = vadd.f32 %v701_v62, %v681_v4  ;;  %v776_v35 = vmul.f32 %v775_v5, %v2489_v60  ;;  %v903_v58 = vstv %s2491_s19 }
 0x112   : > { %v693_v30 = vadd.f32 %v692_v61, %v2300_v7  ;;  %v772_v40 = vstv %s2503_s28  ;;  %v623_v25 = vadd.f32 %v622_v42, %v616_v57  ;;  %v804_v26 = vmul.f32 %v803_v19, %v2228_v16  ;;  %s1263_s14 = sshll.u32 %s3015_s12, 1  ;;  %s3017_s28 = sld [smem:[#allocation82_spill]] }
 0x113   : > { %v818_v27 = vmul.f32 %v817_v32, %v2451_v12  ;;  %v753_v33 = vadd.f32 %v752_v22, %v2419_v20  ;;  %v2982_v13 = vperm.slane %v2306_v9, 0  ;;  %v2983_v28 = vperm.slane %v2306_v9, 1  ;;  %v2984_v20 = vld [vmem:[#allocation70_spill] sm:$0xff]  ;;  %s1363_s25 = sshll.u32 %s3016_s13, 1 }
 0x114   : > { %v697_v50 = vadd.f32 %v696_v44, %v693_v30  ;;  %624 = vst.msk [vmem:[#allocation3 + $0x1] sm:$0x3] %vm1805_vm2, %v623_v25  ;;  %v829_v55 = vstv %s2513_s30  ;;  %v832_v49 = vstv %s2519_s11  ;;  %v835_v41 = vstv %s2523_s8  ;;  %s258_s11 = scalar_lea.vmem [#allocation12], %s1263_s14 }
 0x115   : > { %v827_v62 = vadd.f32 %v2982_v13, %v807_v21  ;;  %v828_v45 = vadd.f32 %v2983_v28, %v808_v54  ;;  %v819_v7 = vadd.f32 %v818_v27, %v804_v26  ;;  %v830_v5 = vmul.f32 %v829_v55, %v2984_v20  ;;  %s1145_s8 = sshll.u32 %s258_s11, 4  ;;  %s1146_s8 = int_to_ptr.vmem [resolvable:$true] %s1145_s8 }
 0x116   : > { %v833_v29 = vmul.f32 %v832_v49, %v2478_v63  ;;  %v836_v61 = vmul.f32 %v835_v41, %v1813_v37  ;;  %v837_v9 = vmul.f32 %v835_v41, %v1815_v38  ;;  %v847_v4 = vperm.slane %v2442_v39, 0 }
 0x117   : > { %v848_v47 = vperm.slane %v2442_v39, 1  ;;  %v853_v19 = vstv %s2530_s9  ;;  %v856_v44 = vstv %s2534_s23  ;;  %v831_v22 = vadd.f32 %v830_v5, %v2484_v43  ;;  %v2985_v39 = vld [vmem:[#allocation72_spill] sm:$0xff] }
 0x118   : > { %v834_v21 = vadd.f32 %v833_v29, %v816_v59  ;;  %v840_v54 = vrot.slane %v837_v9, 7  ;;  %v854_v42 = vmul.f32 %v853_v19, %v2511_v8  ;;  %v773_v10 = vmul.f32 %v772_v40, %v2511_v8  ;;  %s1143_s30 = scalar_lea.hbm %s3017_s28, %s1363_s25 }
 0x119   : > { %v851_v57 = vadd.f32 %v847_v4, %v827_v62  ;;  %v852_v32 = vadd.f32 %v848_v47, %v828_v45  ;;  %v857_v30 = vmul.f32 %v856_v44, %v2489_v60  ;;  %v738_v25 = vadd.f32 %v737_v2, %v2985_v39  ;;  %s1147_s9 = sshll.u32 %s1143_s30, 4  ;;  %s1148_s9 = int_to_ptr.hbm [resolvable:$true] %s1147_s9 }
 0x11a   : > { %v904_v26 = vmul.f32 %v903_v58, %v2478_v63  ;;  %v841_v27 = vsel %vm453_vm1, %v836_v61, %v840_v54  ;;  %v855_v43 = vadd.f32 %v854_v42, %v831_v22  ;;  %v777_v59 = vadd.f32 %v776_v35, %v753_v33  ;;  %v2991_v54 = vld [vmem:[#allocation73_spill] sm:$0xff] }
 0x11b   : > { %v704_v13 = vadd.f32 %v703_v36, %v697_v50  ;;  %v858_v28 = vadd.f32 %v857_v30, %v834_v21  ;;  %v862_v55 = vrot.slane %v852_v32, 7  ;;  %v2986_v49 = vperm.slane %v2376_v52, 0  ;;  %v625_v35 = vld [vmem:[#allocation3] sm:$0x7] }
 0x11c   : > { %v923_v62 = vadd.f32 %v919_v51, %v2389_v46  ;;  %v2987_v2 = vstv %s2088_s4  ;;  %v843_v36 = vadd.f32 %v841_v27, %v819_v7  ;;  %v976_v33 = vperm.slane %v2328_v53, 1  ;;  %627 = vrot.lane.b32.xlu0 %v625_v35, %s1650_s20  ;;  %s2609_s4 = sld [smem:[#allocation11 + $0x59]] }
 0x11d   : > { %v770_v40 = vadd.f32 %v2986_v49, %v2367_v34  ;;  %v2594_v58 = vmul.f32 %v2987_v2, %v2321_v18  ;;  %v774_v34 = vadd.f32 %v773_v10, %v2311_v3  ;;  %705 = vst.msk [vmem:[#allocation3 + $0x1] sm:$0x3] %vm1805_vm2, %v704_v13  ;;  %v859_v52 = vadd.f32 %v858_v28, %v855_v43  ;;  %v2992_v43 = vld [vmem:[#allocation68_spill] sm:$0xff] }
 0x11e   : > { %v863_v46 = vsel %vm453_vm1, %v851_v57, %v862_v55  ;;  %v927_v50 = vstv %s2557_s18  ;;  %v924_v45 = vstv %s2564_s17  ;;  %v762_v3 = vadd.f32 %v2424_v0, %v738_v25  ;;  %s1133_s18 = scalar_lea.sflag [#allocation6], %s3015_s12  ;;  %s1579_s17 = sshra.s32 %s1148_s9, 4  ;;  %s1580_s17 = int_to_ptr.hbm [resolvable:$true] %s1579_s17 }
 0x11f   : > { %v782_v51 = vsel %vm453_vm1, %v770_v40, %v781_v11  ;;  %v865_v7 = vadd.f32 %v863_v46, %v843_v36  ;;  %v2988_v41 = vstv %s2175_s6  ;;  %v905_v5 = vadd.f32 %v904_v26, %v2429_v48  ;;  %v2989_v48 = vld [vmem:[#allocation65_spill] sm:$0xff]  ;;  %s2637_s6 = sld [smem:[#allocation11 + $0x30]]  ;;  %p1586_p9 = scmp.lt.s32.totalorder %s1580_s17, %s3017_s28 }
 0x120   : > { %v889_v20 = vmul.f32 %v2988_v41, %v2451_v12  ;;  %v778_v29 = vadd.f32 %v777_v59, %v774_v34  ;;  %v918_v61 = vperm.slane %v2447_v15, 0  ;;  %v911_v1 = vrot.slane %v2435_v56, 7 }
 0x121   : > { %v984_v11 = vstv %s2574_s26  ;;  %v2622_v9 = vadd.f32 %v865_v7, %v859_v52  ;;  %v987_v4 = vstv %s2578_s10  ;;  %v784_v0 = vadd.f32 %v782_v51, %v762_v3  ;;  %v2995_v7 = vld [vmem:[#allocation64_spill] sm:$0xff]  ;;  %s1581_s26 = scalar_lea.hbm %s1580_s17, 2 }
 0x122   : > { %v928_v47 = vmul.f32 %v927_v50, %v2489_v60  ;;  %v925_v19 = vmul.f32 %v924_v45, %v2511_v8  ;;  %v980_v44 = vadd.f32 %v976_v33, %v2989_v48  ;;  %v2990_v15 = vstv %s1992_s22  ;;  %s2651_s22 = sld [smem:[#allocation11 + $0x61]]  ;;  %p1582_p1 = scmp.ne.s32.totalorder %s1580_s17, %s1581_s26 }
 0x123   : > { %v1034_v56 = vmul.f32 %v2990_v15, %v2332_v24  ;;  %v933_v22 = vrot.slane %v923_v62, 7  ;;  %v1000_v21 = vperm.slane %v2594_v58, 1  ;;  %v890_v42 = vadd.f32 %v889_v20, %v2991_v54  ;;  %v2997_v20 = vld [vmem:[#allocation67_spill] sm:$0xff] }
 0x124   : > { %v929_v10 = vadd.f32 %v928_v47, %v905_v5  ;;  %v985_v57 = vmul.f32 %v984_v11, %v2478_v63  ;;  %v785_v32 = vadd.f32 %v784_v0, %v778_v29  ;;  %v922_v30 = vadd.f32 %v918_v61, %v2381_v23  ;;  %v706_v26 = vld [vmem:[#allocation3] sm:$0x7]  ;;  %v2994_v23 = vld [vmem:[#allocation76_spill] sm:$0xff]  ;;  %v2998_v61 = vld [vmem:[#allocation74_spill] sm:$0xff]  ;;  %p1583_p4 = pnand %p1582_p1, %p1753_p3 }
 0x125   : > { %v912_v39 = vsel %vm453_vm1, %v2432_v14, %v911_v1  ;;  %v969_v25 = vstv %s2596_s0  ;;  %v989_v24 = vmul.f32 %v987_v4, %v1815_v38  ;;  %v1057_v27 = vperm.slane %v2337_v17, 1  ;;  %708 = vrot.lane.b32.xlu2 %v706_v26, %s1651_s15  ;;  %v2999_v15 = vld [vmem:[#allocation75_spill] sm:$0xff] }
 0x126   : > { %v968_v59 = vadd.f32 %v2992_v43, %v2405_v6  ;;  %v2993_v13 = vstv %s2100_s21  ;;  %v926_v55 = vadd.f32 %v925_v19, %v2994_v23  ;;  %786 = vst.msk [vmem:[#allocation3 + $0x1] sm:$0x3] %vm1805_vm2, %v785_v32  ;;  %v1004_v14 = vadd.f32 %v1000_v21, %v980_v44  ;;  %s3003_s21 = sld [smem:[#allocation39_spill]]  ;;  %p1584_p8 = pneg %p1583_p4 }
 0x127   : > { %v2649_v28 = vmul.f32 %v2993_v13, %v2321_v18  ;;  %v934_v49 = vsel %vm453_vm1, %v922_v30, %v933_v22  ;;  %v1008_v40 = vstv %s2599_s2  ;;  %v1005_v6 = vstv %s2609_s4  ;;  %v3000_v22 = vld [vmem:[#allocation63_spill] sm:$0xff]  ;;  %s1585_s2 = scalar_lea.hbm %s3017_s28, 4 }
 0x128   : > { %v914_v18 = vadd.f32 %v912_v39, %v890_v42  ;;  %v970_v62 = vmul.f32 %v969_v25, %v2451_v12  ;;  %v986_v2 = vadd.f32 %v985_v57, %v968_v59  ;;  %v930_v35 = vadd.f32 %v929_v10, %v926_v55  ;;  %v3001_v42 = vld [vmem:[#allocation69_spill] sm:$0xff]  ;;  %p1587_p10 = scmp.lt.s32.totalorder %s1585_s2, %s1581_s26 }
 0x129   : > { %v999_v36 = vperm.slane %v2594_v58, 0  ;;  %v988_v33 = vmul.f32 %v987_v4, %v1813_v37  ;;  %v992_v34 = vrot.slane %v989_v24, 7  ;;  %v1065_v52 = vstv %s2619_s7  ;;  %v3002_v57 = vld [vmem:[#allocation77_spill] sm:$0xff] }
 0x12a   : > { %v1068_v46 = vstv %s2624_s24  ;;  %v936_v51 = vadd.f32 %v934_v49, %v914_v18  ;;  %v1009_v50 = vmul.f32 %v1008_v40, %v2489_v60  ;;  %v1006_v45 = vmul.f32 %v1005_v6, %v2511_v8  ;;  %v3005_v49 = vld [vmem:[#allocation66_spill] sm:$0xff]  ;;  %v3006_v18 = vld [vmem:[#allocation71_spill] sm:$0xff]  ;;  %p1588_p2 = por %p1587_p10, %p1586_p9 }
 0x12b   : > { %v2996_v3 = vperm.slane %v2328_v53, 0  ;;  %v1061_v5 = vadd.f32 %v1057_v27, %v2997_v20  ;;  %v1014_v29 = vrot.slane %v1004_v14, 7  ;;  %v1081_v58 = vperm.slane %v2649_v28, 1 }
 0x12c   : > { %v971_v1 = vadd.f32 %v970_v62, %v2998_v61  ;;  %v1010_v11 = vadd.f32 %v1009_v50, %v986_v2  ;;  %v1066_v4 = vmul.f32 %v1065_v52, %v2478_v63  ;;  %v937_v0 = vadd.f32 %v936_v51, %v930_v35  ;;  %p1589_p11 = pnand %p1588_p2, %p1584_p8 }
 0x12d   : > { %v979_v41 = vadd.f32 %v2996_v3, %v2995_v7  ;;  %v993_v19 = vsel %vm453_vm1, %v988_v33, %v992_v34  ;;  %v1050_v48 = vstv %s2637_s6  ;;  %v1070_v53 = vmul.f32 %v1068_v46, %v1815_v38  ;;  %v787_v44 = vld [vmem:[#allocation3] sm:$0x7] }
 0x12e   : > { %v1046_v21 = vadd.f32 %v3000_v22, %v2999_v15  ;;  %v1056_v54 = vperm.slane %v2337_v17, 0  ;;  %v1049_v10 = vadd.f32 %v3001_v42, %v1034_v56  ;;  %v1007_v63 = vadd.f32 %v1006_v45, %v3002_v57  ;;  %789 = vrot.lane.b32.xlu1 %v787_v44, %s1652_s1  ;;  %938 = vst.msk [vmem:[#allocation3 + $0x1] sm:$0x3] %vm1805_vm2, %v937_v0  ;;  %v401_v45 = vld [vmem:[#allocation10] sm:$0x3] }
 0x12f   : > { %v1003_v47 = vadd.f32 %v999_v36, %v979_v41  ;;  %v1085_v32 = vadd.f32 %v1081_v58, %v1061_v5  ;;  %v1089_v38 = vstv %s2651_s22  ;;  %v1086_v39 = vstv %s2658_s16 }
 0x130   : > { %v995_v25 = vadd.f32 %v993_v19, %v971_v1  ;;  %v1051_v24 = vmul.f32 %v1050_v48, %v2451_v12  ;;  %v1067_v26 = vadd.f32 %v1066_v4, %v1049_v10  ;;  %v1011_v17 = vadd.f32 %v1010_v11, %v1007_v63 }
 0x131   : > { %v1015_v30 = vsel %vm453_vm1, %v1003_v47, %v1014_v29  ;;  %v1080_v56 = vperm.slane %v2649_v28, 0  ;;  %v1069_v27 = vmul.f32 %v1068_v46, %v1813_v37  ;;  %v1073_v43 = vrot.slane %v1070_v53, 7 }
 0x132   : > { %v3004_v59 = vstv %s3003_s21  ;;  %v1017_v23 = vadd.f32 %v1015_v30, %v995_v25  ;;  %v1090_v55 = vmul.f32 %v1089_v38, %v2489_v60  ;;  %v1087_v14 = vmul.f32 %v1086_v39, %v2511_v8 }
 0x133   : > { %v1037_v13 = vmul.f32 %v3004_v59, %v2228_v16  ;;  %v1060_v40 = vadd.f32 %v1056_v54, %v3005_v49  ;;  %v1095_v6 = vrot.slane %v1085_v32, 7  ;;  %v1064_v12 = vadd.f32 %v3006_v18, %v1046_v21 }
 0x134   : > { %v1091_v2 = vadd.f32 %v1090_v55, %v1067_v26  ;;  %v1018_v35 = vadd.f32 %v1017_v23, %v1011_v17  ;;  %v1074_v37 = vsel %vm453_vm1, %v1069_v27, %v1073_v43  ;;  %v422_v3 = vadd.s32 4294967295, %v401_v45 }
 0x135   : > { %v1052_v62 = vadd.f32 %v1051_v24, %v1037_v13  ;;  %v1084_v28 = vadd.f32 %v1080_v56, %v1060_v40  ;;  %v939_v36 = vld [vmem:[#allocation3 + $0x1] sm:$0x7]  ;;  %v1088_v33 = vadd.f32 %v1087_v14, %v1064_v12  ;;  %v406_v20 = vadd.s32 4294967293, %v401_v45 }
 0x136   : > { %941 = vrot.lane.b32.xlu0 %v939_v36, %s1653_s3  ;;  %1019 = vst.msk [vmem:[#allocation3 + $0x1] sm:$0x3] %vm1805_vm2, %v1018_v35  ;;  %v430_v5 = vadd.s32 1, %v401_v45  ;;  %v414_v58 = vadd.s32 4294967294, %v401_v45  ;;  %vm424_vm8 = vcmp.lt.s32.totalorder %v422_v3, 16  ;;  %vm792_vm9 = vcmask 130048  }
 0x137   : > { %v1096_v16 = vsel %vm453_vm1, %v1084_v28, %v1095_v6  ;;  %v1076_v60 = vadd.f32 %v1074_v37, %v1052_v62  ;;  %v1092_v8 = vadd.f32 %v1091_v2, %v1088_v33  ;;  %vm423_vm1 = vcmp.ge.s32.totalorder %v422_v3, 0 }
 0x138   : > { %vm407_vm12 = vcmp.ge.s32.totalorder %v406_v20, 0  ;;  %vm408_vm0 = vcmp.lt.s32.totalorder %v406_v20, 16  ;;  %vm431_vm5 = vcmp.ge.s32.totalorder %v430_v5, 0  ;;  %vm432_vm6 = vcmp.lt.s32.totalorder %v430_v5, 16  ;;  %vm2704_vm11 = vmand %vm423_vm1, %vm424_vm8 }
 0x139   : > { %v1098_v34 = vadd.f32 %v1096_v16, %v1076_v60  ;;  %vm944_vm7 = vcmask 916480   ;;  %vm711_vm10 = vcmask 261120   ;;  %v446_v47 = vadd.s32 3, %v401_v45  ;;  %vm2710_vm15 = vmand %vm407_vm12, %vm408_vm0 }
 0x13a   : > { %vm415_vm13 = vcmp.ge.s32.totalorder %v414_v58, 0  ;;  %vm416_vm14 = vcmp.lt.s32.totalorder %v414_v58, 16  ;;  %v438_v44 = vadd.s32 2, %v401_v45  ;;  %vm2716_vm3 = vmand %vm431_vm5, %vm432_vm6  ;;  %vm1106_vm12 = vcmask 654336  }
 0x13b   : > { %v1099_v52 = vadd.f32 %v1098_v34, %v1092_v8  ;;  %vm2722_vm1 = vmand %vm415_vm13, %vm416_vm14  ;;  %vm447_vm8 = vcmp.ge.s32.totalorder %v446_v47, 0  ;;  %vm1025_vm6 = vcmask 785408  }
 0x13c   : > { %vm439_vm0 = vcmp.ge.s32.totalorder %v438_v44, 0 }
 0x13d   : > { %v1020_v46 = vld [vmem:[#allocation3 + $0x1] sm:$0x7] }
 0x13e   : > { %1022 = vrot.lane.b32.xlu1 %v1020_v46, %s1654_s29  ;;  %1100 = vst.msk [vmem:[#allocation3 + $0x1] sm:$0x3] %vm1805_vm2, %v1099_v52 }
 0x145   : > { %v1101_v51 = vld [vmem:[#allocation3 + $0x1] sm:$0x7] }
 0x146   : > { %1103 = vrot.lane.b32.xlu2 %v1101_v51, %s1655_s5 }
 0x17f   : > { %v709_v7 = vpop.permute.xlu2 %708 }
 0x180   : > { %v710_v1 = vrot.slane %v709_v7, 1 }
 0x182   : > { %v712_v54 = vsel %vm711_vm10, %v709_v7, %v710_v1 }
 0x183   : > { %v714_v38 = vsel %vm2722_vm1, %v712_v54, 0.0 }
 0x184   : > { %v867_v17 = vadd.f32 %v2622_v9, %v714_v38 }
 0x18e   : > { %v628_v50 = vpop.permute.xlu0 %627 }
 0x18f   : > { %v629_v61 = vrot.slane %v628_v50, 1 }
 0x191   : > { %v631_v15 = vsel %vm630_vm4, %v628_v50, %v629_v61  ;;  %vm440_vm4 = vcmp.lt.s32.totalorder %v438_v44, 16 }
 0x192   : > { %v633_v63 = vsel %vm2710_vm15, %v631_v15, 0.0 }
 0x1a0   : > { %v790_v41 = vpop.permute.xlu1 %789  ;;  %v1104_v53 = vpop.permute.xlu2 %1103 }
 0x1a1   : > { %v791_v29 = vrot.slane %v790_v41, 1  ;;  %v1105_v57 = vrot.slane %v1104_v53, 1 }
 0x1a3   : > { %v793_v0 = vsel %vm792_vm9, %v790_v41, %v791_v29  ;;  %vm448_vm9 = vcmp.lt.s32.totalorder %v446_v47, 16  ;;  %v1107_v25 = vsel %vm1106_vm12, %v1104_v53, %v1105_v57 }
 0x1a4   : > { %v795_v42 = vsel %vm2704_vm11, %v793_v0, 0.0  ;;  %vm449_vm5 = vmand %vm447_vm8, %vm448_vm9 }
 0x1a5   : > { %v796_v30 = vadd.f32 %v795_v42, %v633_v63  ;;  %v1109_v27 = vsel %vm449_vm5, %v1107_v25, 0.0 }
 0x1a8   : > { %v942_v11 = vpop.permute.xlu0 %941 }
 0x1a9   : > { %v943_v19 = vrot.slane %v942_v11, 1 }
 0x1ab   : > { %v945_v21 = vsel %vm944_vm7, %v942_v11, %v943_v19  ;;  %vm441_vm7 = vmand %vm439_vm0, %vm440_vm4 }
 0x1ac   : > { %v947_v32 = vsel %vm2716_vm3, %v945_v21, 0.0 }
 0x1ad   : > { %v948_v24 = vadd.f32 %v947_v32, %v796_v30 }
 0x1af   : > { %v1110_v59 = vadd.f32 %v1109_v27, %v948_v24 }
 0x1b0   : > { %v1023_v39 = vpop.permute.xlu1 %1022 }
 0x1b1   : > { %v1024_v26 = vrot.slane %v1023_v39, 1 }
 0x1b3   : > { %v1026_v56 = vsel %vm1025_vm6, %v1023_v39, %v1024_v26 }
 0x1b4   : > { %v1028_v43 = vsel %vm441_vm7, %v1026_v56, 0.0 }
 0x1b5   : > { %v1029_v13 = vadd.f32 %v1028_v43, %v867_v17 }
 0x1b7   : > { %v1111_v23 = vadd.f32 %v1110_v59, %v1029_v13 }
 0x1b9   : > { %v1361_v55 = vmul.f32 -1.442695, %v1111_v23 }
 0x1bb   : > { %1456 = vpow2.f32 %v1361_v55 }
 0x1c1   : > { %v1457_v14 = vpop.eup %1456 }
 0x1c2   : > { %v1115_v49 = vadd.f32 1.0, %v1457_v14 }
 0x1c4   : > { %1458 = vrcp.f32 %v1115_v49  ;;  %v1127_v9 = vand.u32 2147483648, %v1115_v49  ;;  %v1125_v62 = vand.u32 2147483647, %v1115_v49  ;;  %vm1121_vm11 = vweird.f32 %v1115_v49 }
 0x1c6   : > { %v1128_v35 = vor.u32 1.1754944e-38, %v1127_v9  ;;  %vm1126_vm14 = vcmp.eq.f32.partialorder %v1125_v62, 8.507059e+37 }
 0x1ca   : > { %v1459_v40 = vpop.eup %1458 }
 0x1cb   : > { %v1117_v6 = vmul.f32 %v1459_v40, %v1115_v49  ;;  %vm1122_vm10 = vweird.f32 %v1459_v40 }
 0x1cc   : > { %vm1123_vm13 = vmor %vm1121_vm11, %vm1122_vm10 }
 0x1cd   : > { %v1118_v18 = vsub.f32 1.0, %v1117_v6 }
 0x1cf   : > { %v1119_v12 = vmul.f32 %v1459_v40, %v1118_v18 }
 0x1d1   : > { %v1120_v2 = vadd.f32 %v1459_v40, %v1119_v12 }
 0x1d3   : > { %v1124_v28 = vsel %vm1123_vm13, %v1459_v40, %v1120_v2 }
 0x1d4   : > { %v1129_v37 = vsel %vm1126_vm14, %v1128_v35, %v1124_v28 }
 0x1d5   : > { %1131 = vst.msk [vmem:[%s258_s11] sm:$0x3] %vm1805_vm2, %v1129_v37 }
 0x1d6   : > { %1592 = shalt.err (!%p1589_p11)
}
 0x1d7   : > { %1381 = dma.vmem_to_hbm [thread:$0]  (%p1753_p3), %s1146_s8, 32, %s1148_s9, %s1133_s18  }
 0x1d8 PF: > { %s3019_s7 = sld [smem:[#allocation17_spill]] }
 0x1d9   : > { %s3021_s6 = sld [smem:[#allocation20_spill]] }
 0x1de   : > { %s1159_s22 = sand.u32 1, %s3019_s7  }
 0x1df   : > { %p3022_p12 = scmp.ge.s32.totalorder %s3021_s6, 2  ;;  %s1160_s15 = scalar_lea.sflag [#allocation6], %s1159_s22 }
 0x1e1   : > { %p1398_p13 = pnand %p3022_p12, %p1716_p6 }
 0x1e3   : > { %p1399_p0 = pneg %p1398_p13 }
 0x1e5   : > { %1622 = dma.done.wait (%p1399_p0), %s1160_s15, 32  }
 0x1e6   : > { %1624 = vsyncadd (%p1399_p0), %s1160_s15, 4294967264  ;;  %s3023_s18 = sld [smem:[#allocation23_spill]] }
 0x1e7   : > { %s3024_s15 = sld [smem:[#allocation18_spill]] }
 0x1e8   : > { %s3025_s16 = sld [smem:[#allocation19_spill]] }
 0x1e9   : > { %s3026_s17 = sld [smem:[#allocation24_spill]] }
 0x1ec   : > { %p19_p5 = scmp.ge.s32.totalorder %s3023_s18, 4  }
 0x1ee   :  { %21 = sbr.rel (!%p19_p5) target bundleno = 13 (0xd), region = 95 }
 0x1f3   :  { %1166 = vsyncpa [#allocation5], 1 }
 0x1f4   :  { %1168 = vsyncpa [#allocation5 + $0x1], 1 }
 0x1f5   :  { %1169 = vsyncpa [#allocation9], 1 }
 0x1f6   :  { %1170 = vsyncpa [#allocation6], 1 }
 0x1f7   :  { %1172 = vsyncpa [#allocation6 + $0x1], 1 }
 0x1f8   :  { %1173 = vsyncpa [#allocation7], 1 }
 0x1f9   :  { %1175 = vsyncpa [#allocation7 + $0x1], 1 }

</bundles_post_ra>
